<compile_context>
chip_gen: v6e
topology: v6e:2x2x1
jax: 0.10.0
libtpu: 0.0.40
codegen_flags: <defaults>
</compile_context>

<pallas_src>
import functools

import numpy as np
import jax
import jax.numpy as jnp
from jax.experimental import pallas as pl
from jax.experimental.pallas import tpu as pltpu

NEG_SLOPE = 0.01  # PyTorch F.leaky_relu default negative_slope


def _round_up(v, m):
    return ((v + m - 1) // m) * m


def _leaky_relu(h):
    return jnp.where(h > 0, h, NEG_SLOPE * h)


def proxy_loss_kernel(use_pe, x_ref, *refs):
    """Fused forward on one lane-dense batch tile.

    x_ref: (D_pad, Bt) f32, batch on the lane axis.
    use_pe=True : refs = (F, W0x, W0sin, W0cos, b0, W1, b1, ..., WL, bL, out)
    use_pe=False: refs = (W0, b0, ..., WL, bL, out)
    Weights are bf16 (out, in); biases f32 (out, 1); out f32 (out_dim, Bt).
    """
    out_ref = refs[-1]
    refs = refs[:-1]

    if use_pe:
        f_ref, w0x_ref, w0s_ref, w0c_ref, b0_ref = refs[:5]
        rest = refs[5:]
        x = x_ref[...]                                              # (D_pad, Bt) f32
        # xf[k*D + d, :] = 2^k * x[d, :] via one tiny MXU dot (f32, exact: the
        # frequency matrix only holds powers of two) -> no sublane concat needed.
        xf = jnp.dot(f_ref[...], x, preferred_element_type=jnp.float32)
        sin_b = jnp.sin(xf).astype(jnp.bfloat16)                    # EUP sin/cos in f32,
        cos_b = jnp.cos(xf).astype(jnp.bfloat16)                    # bf16 only at the MXU
        # First layer with the weight pre-split into [x | sin | cos] column blocks:
        # three small bf16 dots, f32 accumulation, no feature concatenation.
        acc = jnp.dot(w0x_ref[...], x.astype(jnp.bfloat16),
                      preferred_element_type=jnp.float32)
        acc += jnp.dot(w0s_ref[...], sin_b, preferred_element_type=jnp.float32)
        acc += jnp.dot(w0c_ref[...], cos_b, preferred_element_type=jnp.float32)
        act = _leaky_relu(acc + b0_ref[...])                        # f32 elementwise
        h = act.astype(jnp.bfloat16)                                # single cast per layer
    else:
        rest = refs
        act = None
        h = x_ref[...].astype(jnp.bfloat16)

    n_linear = len(rest) // 2
    for j in range(n_linear):
        w = rest[2 * j][...]                                        # (out, in) bf16
        b = rest[2 * j + 1][...]                                    # (out, 1)  f32
        acc = jnp.dot(w, h, preferred_element_type=jnp.float32)     # bf16 MXU, f32 acc
        act = _leaky_relu(acc + b)                                  # leaky after EVERY layer
        h = act.astype(jnp.bfloat16)                                # feeds next dot directly

    out_ref[...] = act.astype(out_ref.dtype)                        # lane-dense full store


def _sin_cos_cols(D, n_enc):
    """Column indices of PyTorch's interleaved PE order [x, sin f0, cos f0, sin f1, ...]
    that correspond to the kernel's xf ordering (frequency-major, then dim)."""
    sin_cols = [D + 2 * k * D + d for k in range(n_enc) for d in range(D)]
    cos_cols = [D + (2 * k + 1) * D + d for k in range(n_enc) for d in range(D)]
    return np.asarray(sin_cols), np.asarray(cos_cols)


def proxy_loss_forward(x, params, *, use_pe, n_enc, block_b=None, max_block_b=2048):
    """x: (B, D) f32.
    params: list of (W, b) in PyTorch nn.Linear layout: W (out_features, in_features),
    b (out_features,).  block_b=None picks an adaptive lane-dense batch tile."""
    B, D = x.shape
    out_dim = params[-1][0].shape[0]

    # ---- batch tiling: one big tile whenever it fits; even tile count when tiling ----
    B128 = _round_up(B, 128)
    if block_b is None:
        if B128 <= max_block_b:
            block_b = B128                                     # single grid step
        else:
            n_tiles = _round_up(-(-B128 // max_block_b), 2)    # even -> both v7x TCs busy
            block_b = _round_up(-(-B128 // n_tiles), 128)
    block_b = min(_round_up(block_b, 128), max(B128, 128))
    n_tiles = -(-B128 // block_b)
    B_pad = n_tiles * block_b

    D_pad = _round_up(D, 8)   # 8-sublane-aligned input rows / first-layer K dim

    # Layout plumbing stays in the wrapper (accepted HBM round-trip; callers that can
    # hold x in (D, B) and consume (out, B) could drop both transposes).
    xT = jnp.pad(x.astype(jnp.float32).T, ((0, D_pad - D), (0, B_pad - B)))

    flat = []
    in_specs = [pl.BlockSpec((D_pad, block_b), lambda i: (0, i))]

    def _add_resident(arr):
        flat.append(arr)
        # Constant index map -> operand stays resident in VMEM across grid steps.
        in_specs.append(pl.BlockSpec(arr.shape, lambda i: (0, 0)))

    if use_pe:
        # Frequency matrix F[k*D + d, d] = 2^k (f32, exact) -> xf = F @ x on the MXU.
        F = np.zeros((n_enc * D, D_pad), np.float32)
        for k in range(n_enc):
            F[k * D:(k + 1) * D, :D] = np.eye(D, dtype=np.float32) * (2.0 ** k)
        _add_resident(jnp.asarray(F))

        w0, b0 = params[0]
        w0 = jnp.asarray(w0, jnp.float32)
        sin_cols, cos_cols = _sin_cos_cols(D, n_enc)
        _add_resident(jnp.pad(w0[:, :D], ((0, 0), (0, D_pad - D))).astype(jnp.bfloat16))
        _add_resident(w0[:, sin_cols].astype(jnp.bfloat16))
        _add_resident(w0[:, cos_cols].astype(jnp.bfloat16))
        _add_resident(jnp.asarray(b0, jnp.float32).reshape(-1, 1))
        rest_params = list(params[1:])
    else:
        rest_params = list(params)
        w0, b0 = rest_params[0]
        w0 = jnp.pad(jnp.asarray(w0, jnp.float32), ((0, 0), (0, D_pad - D)))
        rest_params[0] = (w0, b0)

    for (w, b) in rest_params:
        _add_resident(jnp.asarray(w, jnp.float32).astype(jnp.bfloat16))   # (out, in) bf16
        _add_resident(jnp.asarray(b, jnp.float32).reshape(-1, 1))         # (out, 1)  f32

    kernel = functools.partial(proxy_loss_kernel, use_pe)

    outT = pl.pallas_call(
        kernel,
        out_shape=jax.ShapeDtypeStruct((out_dim, B_pad), jnp.float32),
        grid=(n_tiles,),
        in_specs=in_specs,
        out_specs=pl.BlockSpec((out_dim, block_b), lambda i: (0, i)),     # lane-dense output
        compiler_params=pltpu.CompilerParams(dimension_semantics=("parallel",)),
    )(xT, *flat)

    return outT[:, :B].T


# ---------------- pure-JAX reference (mirrors the PyTorch module exactly) ----------------
def reference_forward(x, params, *, use_pe, n_enc):
    if use_pe:
        enc = [x]
        for k in range(n_enc):
            f = 2.0 ** k
            enc.append(jnp.sin(x * f))
            enc.append(jnp.cos(x * f))
        x = jnp.concatenate(enc, axis=-1)
    for (w, b) in params:                     # nn.Linear: y = x @ W.T + b
        x = x @ w.T + b
        x = jnp.where(x > 0, x, NEG_SLOPE * x)
    return x


# ---------------- deterministic parameter init (synthetic, nn.Linear layout) ----------------
def init_params(key, layer_dims):
    params = []
    for (fan_in, fan_out) in layer_dims:
        key, kw, kb = jax.random.split(key, 3)
        bound = 1.0 / (fan_in ** 0.5)          # same bound PyTorch nn.Linear uses
        w = jax.random.uniform(kw, (fan_out, fan_in), jnp.float32, -bound, bound)
        b = jax.random.uniform(kb, (fan_out,), jnp.float32, -bound, bound)
        params.append((w, b))
    return params


if __name__ == "__main__":
    # Module hyperparameters (consistent with ProxyLoss.__init__).
    problem_dim = 4
    use_pe = True
    n_enc = 6
    out_dimension = 8
    n_layers = 3
    n_hidden = 32
    batch = 256   # adaptive tiling -> one 256-wide lane-dense tile, single grid step

    infeatures = problem_dim if not use_pe else 2 * n_enc * problem_dim + problem_dim  # 52

    layer_dims = [(infeatures, n_hidden)]
    layer_dims += [(n_hidden, n_hidden)] * (n_layers - 1)
    layer_dims += [(n_hidden, out_dimension)]

    key = jax.random.PRNGKey(0)
    key, kx = jax.random.split(key)
    x = jax.random.normal(kx, (batch, problem_dim), dtype=jnp.float32)
    params = init_params(key, layer_dims)

    out = jax.block_until_ready(proxy_loss_forward(x, params, use_pe=use_pe, n_enc=n_enc))
    ref = reference_forward(x, params, use_pe=use_pe, n_enc=n_enc)
    assert out.shape == (batch, out_dimension)
    # bf16 MXU weights/activations vs f32 reference -> relaxed tolerance (observed ~1e-3).
    assert jnp.allclose(out, ref, atol=2e-2, rtol=2e-2), (
        f"PE kernel mismatch vs reference (max err {float(jnp.max(jnp.abs(out - ref)))})")

    # Also exercise the use_pe=False branch of the kernel.
    layer_dims_np = [(problem_dim, n_hidden)]
    layer_dims_np += [(n_hidden, n_hidden)] * (n_layers - 1)
    layer_dims_np += [(n_hidden, out_dimension)]
    key, k2 = jax.random.split(key)
    params_np = init_params(k2, layer_dims_np)
    out2 = jax.block_until_ready(proxy_loss_forward(x, params_np, use_pe=False, n_enc=n_enc))
    ref2 = reference_forward(x, params_np, use_pe=False, n_enc=n_enc)
    assert jnp.allclose(out2, ref2, atol=2e-2, rtol=2e-2), (
        f"non-PE kernel mismatch vs reference (max err {float(jnp.max(jnp.abs(out2 - ref2)))})")

    print("KERNEL_OK")
</pallas_src>

<mosaic_0001>
module attributes {stable_mosaic.version = 11 : i64} {
  func.func @proxy_loss_kernel(%arg0: i32, %arg1: memref<8x256xf32, #tpu.memory_space<vmem>>, %arg2: memref<24x8xf32, #tpu.memory_space<vmem>>, %arg3: memref<32x8xbf16, #tpu.memory_space<vmem>>, %arg4: memref<32x24xbf16, #tpu.memory_space<vmem>>, %arg5: memref<32x24xbf16, #tpu.memory_space<vmem>>, %arg6: memref<32x1xf32, #tpu.memory_space<vmem>>, %arg7: memref<32x32xbf16, #tpu.memory_space<vmem>>, %arg8: memref<32x1xf32, #tpu.memory_space<vmem>>, %arg9: memref<32x32xbf16, #tpu.memory_space<vmem>>, %arg10: memref<32x1xf32, #tpu.memory_space<vmem>>, %arg11: memref<8x32xbf16, #tpu.memory_space<vmem>>, %arg12: memref<8x1xf32, #tpu.memory_space<vmem>>, %arg13: memref<8x256xf32, #tpu.memory_space<vmem>>) attributes {dimension_semantics = [#tpu.dimension_semantics<parallel>], iteration_bounds = array<i64: 1>, scalar_prefetch = 0 : i64, scratch_operands = 0 : i64, tpu.core_type = #tpu.core_type<tc>, window_params = [{transform_indices = @transform_0, window_bounds = array<i64: 8, 256>}, {pipeline_mode = #tpu.pipeline_mode<synchronous>, transform_indices = @transform_1, window_bounds = array<i64: 24, 8>}, {pipeline_mode = #tpu.pipeline_mode<synchronous>, transform_indices = @transform_2, window_bounds = array<i64: 32, 8>}, {pipeline_mode = #tpu.pipeline_mode<synchronous>, transform_indices = @transform_3, window_bounds = array<i64: 32, 24>}, {pipeline_mode = #tpu.pipeline_mode<synchronous>, transform_indices = @transform_4, window_bounds = array<i64: 32, 24>}, {pipeline_mode = #tpu.pipeline_mode<synchronous>, transform_indices = @transform_5, window_bounds = array<i64: 32, 1>}, {pipeline_mode = #tpu.pipeline_mode<synchronous>, transform_indices = @transform_6, window_bounds = array<i64: 32, 32>}, {pipeline_mode = #tpu.pipeline_mode<synchronous>, transform_indices = @transform_7, window_bounds = array<i64: 32, 1>}, {pipeline_mode = #tpu.pipeline_mode<synchronous>, transform_indices = @transform_8, window_bounds = array<i64: 32, 32>}, {pipeline_mode = #tpu.pipeline_mode<synchronous>, transform_indices = @transform_9, window_bounds = array<i64: 32, 1>}, {pipeline_mode = #tpu.pipeline_mode<synchronous>, transform_indices = @transform_10, window_bounds = array<i64: 8, 32>}, {pipeline_mode = #tpu.pipeline_mode<synchronous>, transform_indices = @transform_11, window_bounds = array<i64: 8, 1>}, {transform_indices = @transform_12, window_bounds = array<i64: 8, 256>}]} {
    %c0 = arith.constant 0 : index
    %c0_0 = arith.constant 0 : index
    %0 = vector.load %arg1[%c0, %c0_0] : memref<8x256xf32, #tpu.memory_space<vmem>>, vector<8x256xf32>
    %c0_1 = arith.constant 0 : index
    %c0_2 = arith.constant 0 : index
    %1 = vector.load %arg2[%c0_1, %c0_2] : memref<24x8xf32, #tpu.memory_space<vmem>>, vector<24x8xf32>
    %cst = arith.constant dense<0.000000e+00> : vector<24x256xf32>
    %2 = tpu.matmul %1, %0, %cst {dimension_numbers = #tpu.dot_dimension_numbers<[1], [0], [0], [1], [0, 0, 1, 1], [], []>} : vector<24x8xf32>, vector<8x256xf32>, vector<24x256xf32> -> vector<24x256xf32>
    %3 = math.sin %2 : vector<24x256xf32>
    %4 = arith.truncf %3 : vector<24x256xf32> to vector<24x256xbf16>
    %5 = math.cos %2 : vector<24x256xf32>
    %6 = arith.truncf %5 : vector<24x256xf32> to vector<24x256xbf16>
    %c0_3 = arith.constant 0 : index
    %c0_4 = arith.constant 0 : index
    %7 = vector.load %arg3[%c0_3, %c0_4] : memref<32x8xbf16, #tpu.memory_space<vmem>>, vector<32x8xbf16>
    %8 = arith.truncf %0 : vector<8x256xf32> to vector<8x256xbf16>
    %cst_5 = arith.constant dense<0.000000e+00> : vector<32x256xf32>
    %9 = tpu.matmul %7, %8, %cst_5 {dimension_numbers = #tpu.dot_dimension_numbers<[1], [0], [0], [1], [0, 0, 1, 1], [], []>} : vector<32x8xbf16>, vector<8x256xbf16>, vector<32x256xf32> -> vector<32x256xf32>
    %c0_6 = arith.constant 0 : index
    %c0_7 = arith.constant 0 : index
    %10 = vector.load %arg4[%c0_6, %c0_7] : memref<32x24xbf16, #tpu.memory_space<vmem>>, vector<32x24xbf16>
    %cst_8 = arith.constant dense<0.000000e+00> : vector<32x256xf32>
    %11 = tpu.matmul %10, %4, %cst_8 {dimension_numbers = #tpu.dot_dimension_numbers<[1], [0], [0], [1], [0, 0, 1, 1], [], []>} : vector<32x24xbf16>, vector<24x256xbf16>, vector<32x256xf32> -> vector<32x256xf32>
    %12 = arith.addf %9, %11 : vector<32x256xf32>
    %c0_9 = arith.constant 0 : index
    %c0_10 = arith.constant 0 : index
    %13 = vector.load %arg5[%c0_9, %c0_10] : memref<32x24xbf16, #tpu.memory_space<vmem>>, vector<32x24xbf16>
    %cst_11 = arith.constant dense<0.000000e+00> : vector<32x256xf32>
    %14 = tpu.matmul %13, %6, %cst_11 {dimension_numbers = #tpu.dot_dimension_numbers<[1], [0], [0], [1], [0, 0, 1, 1], [], []>} : vector<32x24xbf16>, vector<24x256xbf16>, vector<32x256xf32> -> vector<32x256xf32>
    %15 = arith.addf %12, %14 : vector<32x256xf32>
    %c0_12 = arith.constant 0 : index
    %c0_13 = arith.constant 0 : index
    %16 = vector.load %arg6[%c0_12, %c0_13] : memref<32x1xf32, #tpu.memory_space<vmem>>, vector<32x1xf32>
    %17 = vector.broadcast %16 : vector<32x1xf32> to vector<32x256xf32>
    %18 = arith.addf %15, %17 : vector<32x256xf32>
    %cst_14 = arith.constant 0.000000e+00 : f32
    %19 = vector.broadcast %cst_14 : f32 to vector<32x256xf32>
    %20 = arith.cmpf ogt, %18, %19 : vector<32x256xf32>
    %cst_15 = arith.constant 0.00999999977 : f32
    %21 = vector.broadcast %cst_15 : f32 to vector<32x256xf32>
    %22 = arith.mulf %21, %18 : vector<32x256xf32>
    %23 = arith.select %20, %18, %22 : vector<32x256xi1>, vector<32x256xf32>
    %24 = arith.truncf %23 : vector<32x256xf32> to vector<32x256xbf16>
    %c0_16 = arith.constant 0 : index
    %c0_17 = arith.constant 0 : index
    %25 = vector.load %arg7[%c0_16, %c0_17] : memref<32x32xbf16, #tpu.memory_space<vmem>>, vector<32x32xbf16>
    %c0_18 = arith.constant 0 : index
    %c0_19 = arith.constant 0 : index
    %26 = vector.load %arg8[%c0_18, %c0_19] : memref<32x1xf32, #tpu.memory_space<vmem>>, vector<32x1xf32>
    %cst_20 = arith.constant dense<0.000000e+00> : vector<32x256xf32>
    %27 = tpu.matmul %25, %24, %cst_20 {dimension_numbers = #tpu.dot_dimension_numbers<[1], [0], [0], [1], [0, 0, 1, 1], [], []>} : vector<32x32xbf16>, vector<32x256xbf16>, vector<32x256xf32> -> vector<32x256xf32>
    %28 = vector.broadcast %26 : vector<32x1xf32> to vector<32x256xf32>
    %29 = arith.addf %27, %28 : vector<32x256xf32>
    %cst_21 = arith.constant 0.000000e+00 : f32
    %30 = vector.broadcast %cst_21 : f32 to vector<32x256xf32>
    %31 = arith.cmpf ogt, %29, %30 : vector<32x256xf32>
    %cst_22 = arith.constant 0.00999999977 : f32
    %32 = vector.broadcast %cst_22 : f32 to vector<32x256xf32>
    %33 = arith.mulf %32, %29 : vector<32x256xf32>
    %34 = arith.select %31, %29, %33 : vector<32x256xi1>, vector<32x256xf32>
    %35 = arith.truncf %34 : vector<32x256xf32> to vector<32x256xbf16>
    %c0_23 = arith.constant 0 : index
    %c0_24 = arith.constant 0 : index
    %36 = vector.load %arg9[%c0_23, %c0_24] : memref<32x32xbf16, #tpu.memory_space<vmem>>, vector<32x32xbf16>
    %c0_25 = arith.constant 0 : index
    %c0_26 = arith.constant 0 : index
    %37 = vector.load %arg10[%c0_25, %c0_26] : memref<32x1xf32, #tpu.memory_space<vmem>>, vector<32x1xf32>
    %cst_27 = arith.constant dense<0.000000e+00> : vector<32x256xf32>
    %38 = tpu.matmul %36, %35, %cst_27 {dimension_numbers = #tpu.dot_dimension_numbers<[1], [0], [0], [1], [0, 0, 1, 1], [], []>} : vector<32x32xbf16>, vector<32x256xbf16>, vector<32x256xf32> -> vector<32x256xf32>
    %39 = vector.broadcast %37 : vector<32x1xf32> to vector<32x256xf32>
    %40 = arith.addf %38, %39 : vector<32x256xf32>
    %cst_28 = arith.constant 0.000000e+00 : f32
    %41 = vector.broadcast %cst_28 : f32 to vector<32x256xf32>
    %42 = arith.cmpf ogt, %40, %41 : vector<32x256xf32>
    %cst_29 = arith.constant 0.00999999977 : f32
    %43 = vector.broadcast %cst_29 : f32 to vector<32x256xf32>
    %44 = arith.mulf %43, %40 : vector<32x256xf32>
    %45 = arith.select %42, %40, %44 : vector<32x256xi1>, vector<32x256xf32>
    %46 = arith.truncf %45 : vector<32x256xf32> to vector<32x256xbf16>
    %c0_30 = arith.constant 0 : index
    %c0_31 = arith.constant 0 : index
    %47 = vector.load %arg11[%c0_30, %c0_31] : memref<8x32xbf16, #tpu.memory_space<vmem>>, vector<8x32xbf16>
    %c0_32 = arith.constant 0 : index
    %c0_33 = arith.constant 0 : index
    %48 = vector.load %arg12[%c0_32, %c0_33] : memref<8x1xf32, #tpu.memory_space<vmem>>, vector<8x1xf32>
    %cst_34 = arith.constant dense<0.000000e+00> : vector<8x256xf32>
    %49 = tpu.matmul %47, %46, %cst_34 {dimension_numbers = #tpu.dot_dimension_numbers<[1], [0], [0], [1], [0, 0, 1, 1], [], []>} : vector<8x32xbf16>, vector<32x256xbf16>, vector<8x256xf32> -> vector<8x256xf32>
    %50 = vector.broadcast %48 : vector<8x1xf32> to vector<8x256xf32>
    %51 = arith.addf %49, %50 : vector<8x256xf32>
    %cst_35 = arith.constant 0.000000e+00 : f32
    %52 = vector.broadcast %cst_35 : f32 to vector<8x256xf32>
    %53 = arith.cmpf ogt, %51, %52 : vector<8x256xf32>
    %cst_36 = arith.constant 0.00999999977 : f32
    %54 = vector.broadcast %cst_36 : f32 to vector<8x256xf32>
    %55 = arith.mulf %54, %51 : vector<8x256xf32>
    %56 = arith.select %53, %51, %55 : vector<8x256xi1>, vector<8x256xf32>
    %c0_37 = arith.constant 0 : index
    %c0_38 = arith.constant 0 : index
    %57 = vector.load %arg13[%c0_37, %c0_38] : memref<8x256xf32, #tpu.memory_space<vmem>>, vector<8x256xf32>
    tpu.vector_store %arg13[%c0_37, %c0_38], %56 {strides = array<i32>} : memref<8x256xf32, #tpu.memory_space<vmem>>, vector<8x256xf32>,
    return
  }
  func.func @transform_0(%arg0: i32) -> (i32, i32) {
    %c0_i32 = arith.constant 0 : i32
    %c0_i32_0 = arith.constant 0 : i32
    return %c0_i32, %arg0 : i32, i32
  }
  func.func @transform_1(%arg0: i32) -> (i32, i32) {
    %c0_i32 = arith.constant 0 : i32
    %c0_i32_0 = arith.constant 0 : i32
    %c0_i32_1 = arith.constant 0 : i32
    return %c0_i32, %c0_i32_0 : i32, i32
  }
  func.func @transform_2(%arg0: i32) -> (i32, i32) {
    %c0_i32 = arith.constant 0 : i32
    %c0_i32_0 = arith.constant 0 : i32
    %c0_i32_1 = arith.constant 0 : i32
    return %c0_i32, %c0_i32_0 : i32, i32
  }
  func.func @transform_3(%arg0: i32) -> (i32, i32) {
    %c0_i32 = arith.constant 0 : i32
    %c0_i32_0 = arith.constant 0 : i32
    %c0_i32_1 = arith.constant 0 : i32
    return %c0_i32, %c0_i32_0 : i32, i32
  }
  func.func @transform_4(%arg0: i32) -> (i32, i32) {
    %c0_i32 = arith.constant 0 : i32
    %c0_i32_0 = arith.constant 0 : i32
    %c0_i32_1 = arith.constant 0 : i32
    return %c0_i32, %c0_i32_0 : i32, i32
  }
  func.func @transform_5(%arg0: i32) -> (i32, i32) {
    %c0_i32 = arith.constant 0 : i32
    %c0_i32_0 = arith.constant 0 : i32
    %c0_i32_1 = arith.constant 0 : i32
    return %c0_i32, %c0_i32_0 : i32, i32
  }
  func.func @transform_6(%arg0: i32) -> (i32, i32) {
    %c0_i32 = arith.constant 0 : i32
    %c0_i32_0 = arith.constant 0 : i32
    %c0_i32_1 = arith.constant 0 : i32
    return %c0_i32, %c0_i32_0 : i32, i32
  }
  func.func @transform_7(%arg0: i32) -> (i32, i32) {
    %c0_i32 = arith.constant 0 : i32
    %c0_i32_0 = arith.constant 0 : i32
    %c0_i32_1 = arith.constant 0 : i32
    return %c0_i32, %c0_i32_0 : i32, i32
  }
  func.func @transform_8(%arg0: i32) -> (i32, i32) {
    %c0_i32 = arith.constant 0 : i32
    %c0_i32_0 = arith.constant 0 : i32
    %c0_i32_1 = arith.constant 0 : i32
    return %c0_i32, %c0_i32_0 : i32, i32
  }
  func.func @transform_9(%arg0: i32) -> (i32, i32) {
    %c0_i32 = arith.constant 0 : i32
    %c0_i32_0 = arith.constant 0 : i32
    %c0_i32_1 = arith.constant 0 : i32
    return %c0_i32, %c0_i32_0 : i32, i32
  }
  func.func @transform_10(%arg0: i32) -> (i32, i32) {
    %c0_i32 = arith.constant 0 : i32
    %c0_i32_0 = arith.constant 0 : i32
    %c0_i32_1 = arith.constant 0 : i32
    return %c0_i32, %c0_i32_0 : i32, i32
  }
  func.func @transform_11(%arg0: i32) -> (i32, i32) {
    %c0_i32 = arith.constant 0 : i32
    %c0_i32_0 = arith.constant 0 : i32
    %c0_i32_1 = arith.constant 0 : i32
    return %c0_i32, %c0_i32_0 : i32, i32
  }
  func.func @transform_12(%arg0: i32) -> (i32, i32) {
    %c0_i32 = arith.constant 0 : i32
    %c0_i32_0 = arith.constant 0 : i32
    return %c0_i32, %arg0 : i32, i32
  }
}

</mosaic_0001>

<bundles_post_ra>
// kernel: tpu_custom_call.1
= control target key start
LH: loop header
LB: loop body
LE: loop exit
PB: predicated region body
PF: predicated region fallthrough
CT: control target
= control target key end

     0   :  { %vm48_vm0 = vcmask 64512   ;;  %v2190_v3 = vmov 0.0   ;;  %s3016_s0 = inlined_call_operand.vmem [shape: f32[8,256], index: 0, kind: input, shape index: {}]   ;;  %s3017_s1 = inlined_call_operand.vmem [shape: f32[24,8], index: 1, kind: input, shape index: {}]   ;;  %s3018_s2 = inlined_call_operand.vmem [shape: bf16[32,8], index: 2, kind: input, shape index: {}]   ;;  %s3019_s3 = inlined_call_operand.vmem [shape: bf16[32,24], index: 3, kind: input, shape index: {}]   ;;  %s3020_s4 = inlined_call_operand.vmem [shape: bf16[32,24], index: 4, kind: input, shape index: {}]   ;;  %s3021_s5 = inlined_call_operand.vmem [shape: f32[32,1], index: 5, kind: input, shape index: {}]   ;;  %s3022_s6 = inlined_call_operand.vmem [shape: bf16[32,32], index: 6, kind: input, shape index: {}]   ;;  %s3023_s7 = inlined_call_operand.vmem [shape: f32[32,1], index: 7, kind: input, shape index: {}]   ;;  %s3024_s8 = inlined_call_operand.vmem [shape: bf16[32,32], index: 8, kind: input, shape index: {}]   ;;  %s3025_s9 = inlined_call_operand.vmem [shape: f32[32,1], index: 9, kind: input, shape index: {}]   ;;  %s3026_s10 = inlined_call_operand.vmem [shape: bf16[8,32], index: 10, kind: input, shape index: {}]   ;;  %s3027_s11 = inlined_call_operand.vmem [shape: f32[8,1], index: 11, kind: input, shape index: {}]   ;;  %s3028_s12 = inlined_call_operand.hbm [shape: f32[8,256], index: 12, kind: output, shape index: {}]  }
   0x1   :  { %v2267_v0 = vld [vmem:[%s3016_s0 + $0x8] sm:$0xff]  ;;  %v2272_v1 = vld [vmem:[%s3016_s0] sm:$0xff]  ;;  %122 = vmatprep.mubr.f32.mxu0 %v2190_v3  ;;  %v47_v5 = vld [vmem:[%s3017_s1 + $0x10] sm:$0xff] }
   0x2   :  { %v45_v2 = vld [vmem:[%s3017_s1] sm:$0xff]  ;;  %88 = vmatprep.subr.mxu0 %v2267_v0  ;;  %v46_v4 = vld [vmem:[%s3017_s1 + $0x8] sm:$0xff] }
   0x3   :  { %89 = vmatpush1.msra.mxu0 %v2272_v1 }
   0x4   :  { %2024 = vmatmul.mubr.msk.f32.vlgmr.msra.gmra.mxu0 %vm48_vm0, %v45_v2 }
   0x5   :  { %128 = vmatprep.mubr.f32.mxu0 %v2190_v3 }
   0x8   :  { %2025 = vmatmul.mubr.msk.f32.gmra.mxu0 %vm48_vm0, %v46_v4 }
   0x9   :  { %134 = vmatprep.mubr.f32.mxu0 %v2190_v3 }
   0xa   :  { %17 = vsyncpa [#allocation3], 0  ;;  %v2191_v26 = vmov 683565275   ;;  %v2192_v28 = vmov 2475754826  }
   0xb   :  { %v2193_v31 = vmov 2131351028   ;;  %v2194_v34 = vmov 2102212464   ;;  %v2195_v37 = vmov 920167782  }
   0xc   :  { %2026 = vmatmul.mubr.msk.f32.gmra.mxu0 %vm48_vm0, %v47_v5  ;;  %v2196_v40 = vmov 1326507024   ;;  %s2198_s28 = smov [#allocation2]  }
  0xc4   :  { %v2288_v6 = vpop.f32.mrf.mxu0 }
  0xc5   :  { %v144_v7 = vand.u32 2139095040, %v2288_v6  ;;  %v141_v11 = vand.u32 2147483647, %v2288_v6 }
  0xc6   :  { %v2291_v8 = vpop.f32.mrf.mxu0 }
  0xc7   :  { %v145_v9 = vshrl.u32 %v144_v7, 23  ;;  %v248_v10 = vand.u32 2139095040, %v2291_v8  ;;  %v148_v17 = vand.u32 8388607, %v141_v11  ;;  %v245_v51 = vand.u32 2147483647, %v2291_v8 }
  0xc8   :  { %v2295_v14 = vpop.f32.mrf.mxu0 }
  0xc9   :  { %v2027_v12 = vadd.s32 4294967169, %v145_v9  ;;  %v249_v13 = vshrl.u32 %v248_v10, 23  ;;  %v352_v18 = vand.u32 2139095040, %v2295_v14  ;;  %v149_v22 = vor.u32 8388608, %v148_v17 }
  0xca   :  { %v252_v4 = vand.u32 8388607, %v245_v51 }
  0xcb   :  { %v151_v15 = vadd.s32 1, %v2027_v12  ;;  %v2031_v16 = vadd.s32 4294967169, %v249_v13  ;;  %v353_v24 = vshrl.u32 %v352_v18, 23  ;;  %v189_v54 = vshll.u32 %v149_v22, 8 }
  0xcd   :  { %vm152_vm1 = vcmp.gt.s32.totalorder %v151_v15, 0  ;;  %v255_v20 = vadd.s32 1, %v2031_v16  ;;  %v2035_v60 = vadd.s32 4294967169, %v353_v24 }
  0xce   :  { %v153_v19 = vsel %vm152_vm1, %v151_v15, 0 }
  0xcf   :  { %v155_v21 = vand.u32 31, %v153_v19  ;;  %v2300_v25 = vshrl.u32 %v153_v19, 5  ;;  %vm256_vm2 = vcmp.gt.s32.totalorder %v255_v20, 0 }
  0xd0   :  { %v257_v45 = vsel %vm256_vm2, %v255_v20, 0 }
  0xd1   :  { %v156_v23 = vsub.s32 32, %v155_v21  ;;  %v158_v27 = vshll.u32 %v2191_v26, %v155_v21  ;;  %v161_v29 = vshll.u32 %v2192_v28, %v155_v21  ;;  %v164_v33 = vshll.u32 %v2193_v31, %v155_v21 }
  0xd2   :  { %v167_v36 = vshll.u32 %v2194_v34, %v155_v21  ;;  %v170_v39 = vshll.u32 %v2195_v37, %v155_v21  ;;  %vm173_vm3 = vcmp.lt.s32.totalorder %v2300_v25, 1  ;;  %v259_v48 = vand.u32 31, %v257_v45 }
  0xd3   :  { %v159_v30 = vshrl.u32 %v2192_v28, %v156_v23  ;;  %v162_v32 = vshrl.u32 %v2193_v31, %v156_v23  ;;  %v165_v35 = vshrl.u32 %v2194_v34, %v156_v23  ;;  %v168_v38 = vshrl.u32 %v2195_v37, %v156_v23 }
  0xd4   :  { %v171_v41 = vshrl.u32 %v2196_v40, %v156_v23  ;;  %vm176_vm4 = vcmp.lt.s32.totalorder %v2300_v25, 4  ;;  %vm175_vm5 = vcmp.lt.s32.totalorder %v2300_v25, 3  ;;  %vm174_vm6 = vcmp.lt.s32.totalorder %v2300_v25, 2 }
  0xd5   :  { %v160_v42 = vor.u32 %v159_v30, %v158_v27  ;;  %v163_v43 = vor.u32 %v162_v32, %v161_v29  ;;  %v166_v44 = vor.u32 %v165_v35, %v164_v33  ;;  %v169_v46 = vor.u32 %v168_v38, %v167_v36 }
  0xd6   :  { %v172_v47 = vor.u32 %v171_v41, %v170_v39  ;;  %v2330_v57 = vsub.s32 32, %v259_v48  ;;  %v2347_v5 = vshrl.u32 %v257_v45, 5  ;;  %v157_v13 = vshrl.u32 %v2191_v26, %v156_v23 }
  0xd7   :  { %v181_v49 = vsel %vm173_vm3, %v160_v42, %v163_v43  ;;  %v185_v50 = vsel %vm173_vm3, %v163_v43, %v166_v44  ;;  %v182_v52 = vsel %vm176_vm4, %v169_v46, 920167782  ;;  %v178_v3 = vsel %vm176_vm4, %v166_v44, 2102212464 }
  0xd8   :  { %v186_v53 = vsel %vm176_vm4, %v172_v47, 1326507024  ;;  %v183_v55 = vsel %vm175_vm5, %v166_v44, %v182_v52  ;;  %v263_v7 = vshrl.u32 %v2192_v28, %v2330_v57  ;;  %v266_v9 = vshrl.u32 %v2193_v31, %v2330_v57 }
  0xd9   :  { %v187_v56 = vsel %vm175_vm5, %v169_v46, %v186_v53  ;;  %v184_v58 = vsel %vm174_vm6, %v181_v49, %v183_v55  ;;  %v269_v10 = vshrl.u32 %v2194_v34, %v2330_v57  ;;  %v272_v12 = vshrl.u32 %v2195_v37, %v2330_v57 }
  0xda   :  { %v188_v59 = vsel %vm174_vm6, %v185_v50, %v187_v56  ;;  %v2339_v63 = vmul.u32.u64.low %v189_v54, %v184_v58  ;;  %v2340_v2 = vmul.u32.u64.high %v189_v54, %v184_v58, %v2339_v63  ;;  %v271_v15 = vshll.u32 %v2194_v34, %v259_v48  ;;  %v2396_v56 = vpop.f32.mrf.mxu0 }
  0xdb   :  { %v2336_v61 = vmul.u32.u64.low %v189_v54, %v188_v59  ;;  %v2337_v62 = vmul.u32.u64.high %v189_v54, %v188_v59, %v2336_v61  ;;  %v274_v16 = vshll.u32 %v2195_v37, %v259_v48  ;;  %v275_v17 = vshrl.u32 %v2196_v40, %v2330_v57 }
  0xdc   :  { %v262_v18 = vshll.u32 %v2191_v26, %v259_v48  ;;  %v265_v19 = vshll.u32 %v2192_v28, %v259_v48  ;;  %v268_v20 = vshll.u32 %v2193_v31, %v259_v48  ;;  %v359_v21 = vadd.s32 1, %v2035_v60 }
  0xdd   :  { %v177_v22 = vsel %vm173_vm3, %v157_v13, %v160_v42  ;;  %v179_v23 = vsel %vm175_vm5, %v163_v43, %v178_v3  ;;  %v273_v24 = vor.u32 %v272_v12, %v271_v15  ;;  %v276_v27 = vor.u32 %v275_v17, %v274_v16 }
  0xde   :  { %v264_v29 = vor.u32 %v263_v7, %v262_v18  ;;  %v267_v30 = vor.u32 %v266_v9, %v265_v19  ;;  %v270_v32 = vor.u32 %v269_v10, %v268_v20  ;;  %vm280_vm7 = vcmp.lt.s32.totalorder %v2347_v5, 4 }
  0xdf   :  { %v199_v33 = vadd.s32 1, %v2340_v2  ;;  %v286_v35 = vsel %vm280_vm7, %v273_v24, 920167782  ;;  %vm198_vm8 = vc.u32 %v2337_v62, %v2339_v63  ;;  %v290_v36 = vsel %vm280_vm7, %v276_v27, 1326507024 }
  0xe0   :  { %vm360_vm9 = vcmp.gt.s32.totalorder %v359_v21, 0  ;;  %v180_v38 = vsel %vm174_vm6, %v177_v22, %v179_v23  ;;  %vm277_vm10 = vcmp.lt.s32.totalorder %v2347_v5, 1  ;;  %vm279_vm11 = vcmp.lt.s32.totalorder %v2347_v5, 3 }
  0xe1   :  { %v253_v39 = vor.u32 8388608, %v252_v4  ;;  %v285_v41 = vsel %vm277_vm10, %v264_v29, %v267_v30  ;;  %v287_v42 = vsel %vm279_vm11, %v270_v32, %v286_v35  ;;  %v200_v43 = vsel %vm198_vm8, %v199_v33, %v2340_v2 }
  0xe2   :  { %v289_v44 = vsel %vm277_vm10, %v267_v30, %v270_v32  ;;  %v291_v25 = vsel %vm279_vm11, %v273_v24, %v290_v36  ;;  %v361_v45 = vsel %vm360_vm9, %v359_v21, 0  ;;  %v196_v46 = vmul.u32 %v189_v54, %v180_v38 }
  0xe3   :  { %vm278_vm12 = vcmp.lt.s32.totalorder %v2347_v5, 2  ;;  %v3032_v47 = vand.u32 2147483647, %v2295_v14  ;;  %v363_v48 = vand.u32 31, %v361_v45  ;;  %v293_v53 = vshll.u32 %v253_v39, 8 }
  0xe4   :  { %v288_v49 = vsel %vm278_vm12, %v285_v41, %v287_v42  ;;  %v201_v50 = vadd.s32 %v200_v43, %v196_v46  ;;  %v292_v52 = vsel %vm278_vm12, %v289_v44, %v291_v25  ;;  %v456_v3 = vand.u32 2139095040, %v2396_v56 }
  0xe5   :  { %v364_v55 = vsub.s32 32, %v363_v48  ;;  %v2398_v58 = vmul.u32.u64.low %v293_v53, %v288_v49  ;;  %v2399_v59 = vmul.u32.u64.high %v293_v53, %v288_v49, %v2398_v58  ;;  %v356_v54 = vand.u32 8388607, %v3032_v47 }
  0xe6   :  { %v2404_v60 = vmul.u32.u64.low %v293_v53, %v292_v52  ;;  %v2405_v61 = vmul.u32.u64.high %v293_v53, %v292_v52, %v2404_v60  ;;  %v202_v4 = vadd.s32 536870912, %v201_v50  ;;  %v362_v7 = vshrl.u32 %v361_v45, 5 }
  0xe7   :  { %v367_v2 = vshrl.u32 %v2192_v28, %v364_v55  ;;  %v370_v9 = vshrl.u32 %v2193_v31, %v364_v55  ;;  %v373_v10 = vshrl.u32 %v2194_v34, %v364_v55  ;;  %v366_v12 = vshll.u32 %v2191_v26, %v363_v48 }
  0xe8   :  { %v369_v13 = vshll.u32 %v2192_v28, %v363_v48  ;;  %v375_v15 = vshll.u32 %v2194_v34, %v363_v48  ;;  %v376_v16 = vshrl.u32 %v2195_v37, %v364_v55  ;;  %v282_v17 = vsel %vm280_vm7, %v270_v32, 2102212464 }
  0xe9   :  { %v372_v18 = vshll.u32 %v2193_v31, %v363_v48  ;;  %v379_v19 = vshrl.u32 %v2196_v40, %v364_v55  ;;  %v261_v20 = vshrl.u32 %v2191_v26, %v2330_v57  ;;  %v368_v21 = vor.u32 %v367_v2, %v366_v12 }
  0xea   :  { %v371_v22 = vor.u32 %v370_v9, %v369_v13  ;;  %v377_v23 = vor.u32 %v376_v16, %v375_v15  ;;  %v2421_v24 = vshrl.u32 %v202_v4, 30  ;;  %v357_v27 = vor.u32 8388608, %v356_v54 }
  0xeb   :  { %v374_v33 = vor.u32 %v373_v10, %v372_v18  ;;  %v378_v35 = vshll.u32 %v2195_v37, %v363_v48  ;;  %v281_v36 = vsel %vm277_vm10, %v261_v20, %v264_v29  ;;  %v283_v32 = vsel %vm279_vm11, %v267_v30, %v282_v17 }
  0xec   :  { %vm384_vm13 = vcmp.lt.s32.totalorder %v362_v7, 4  ;;  %v457_v38 = vshrl.u32 %v456_v3, 23  ;;  %v303_v39 = vadd.s32 1, %v2399_v59  ;;  %vm381_vm14 = vcmp.lt.s32.totalorder %v362_v7, 1 }
  0xed   :  { %v380_v57 = vor.u32 %v379_v19, %v378_v35  ;;  %v390_v41 = vsel %vm384_vm13, %v377_v23, 920167782  ;;  %vm302_vm15 = vc.u32 %v2405_v61, %v2398_v58  ;;  %vm383_vm1 = vcmp.lt.s32.totalorder %v362_v7, 3 }
  0xee   :  { %v389_v42 = vsel %vm381_vm14, %v368_v21, %v371_v22  ;;  %v204_v43 = vshll.u32 %v2421_v24, 30  ;;  %v284_v29 = vsel %vm278_vm12, %v281_v36, %v283_v32  ;;  %v391_v30 = vsel %vm383_vm1, %v374_v33, %v390_v41  ;;  %v2467_v32 = vpop.f32.mrf.mxu0 }
  0xef   :  { %vm382_vm2 = vcmp.lt.s32.totalorder %v362_v7, 2  ;;  %v393_v44 = vsel %vm381_vm14, %v371_v22, %v374_v33  ;;  %v397_v25 = vshll.u32 %v357_v27, 8  ;;  %v2039_v45 = vadd.s32 4294967169, %v457_v38 }
  0xf0   :  { %v304_v46 = vsel %vm302_vm15, %v303_v39, %v2399_v59  ;;  %v386_v48 = vsel %vm384_vm13, %v374_v33, 2102212464  ;;  %v392_v49 = vsel %vm382_vm2, %v389_v42, %v391_v30  ;;  %v394_v52 = vsel %vm384_vm13, %v380_v57, 1326507024 }
  0xf1   :  { %v300_v54 = vmul.u32 %v293_v53, %v284_v29  ;;  %v365_v60 = vshrl.u32 %v2191_v26, %v364_v55  ;;  %v395_v5 = vsel %vm383_vm1, %v377_v23, %v394_v52  ;;  %v2444_v2 = vsub.s32 %v201_v50, %v204_v43 }
  0xf2   :  { %v396_v3 = vsel %vm382_vm2, %v393_v44, %v395_v5  ;;  %v2447_v4 = vmul.u32.u64.low %v397_v25, %v392_v49  ;;  %v2448_v9 = vmul.u32.u64.high %v397_v25, %v392_v49, %v2447_v4  ;;  %v387_v12 = vsel %vm383_vm1, %v371_v22, %v386_v48 }
  0xf3   :  { %v305_v59 = vadd.s32 %v304_v46, %v300_v54  ;;  %v385_v10 = vsel %vm381_vm14, %v365_v60, %v368_v21  ;;  %v463_v13 = vadd.s32 1, %v2039_v45  ;;  %v207_v17 = vsub.s32 0, %v2444_v2 }
  0xf4   :  { %v2453_v15 = vmul.u32.u64.low %v397_v25, %v396_v3  ;;  %v2454_v53 = vmul.u32.u64.high %v397_v25, %v396_v3, %v2453_v15  ;;  %v388_v55 = vsel %vm382_vm2, %v385_v10, %v387_v12  ;;  %v407_v50 = vadd.s32 1, %v2448_v9 }
  0xf5   :  { %vm464_vm3 = vcmp.gt.s32.totalorder %v463_v13, 0  ;;  %v306_v18 = vadd.s32 536870912, %v305_v59  ;;  %v404_v20 = vmul.u32 %v397_v25, %v388_v55  ;;  %v3031_v22 = vand.u32 2147483647, %v2396_v56 }
  0xf6   :  { %v465_v16 = vsel %vm464_vm3, %v463_v13, 0  ;;  %vm406_vm4 = vc.u32 %v2454_v53, %v2447_v4  ;;  %v2028_v27 = vmin.u32 %v207_v17, %v2444_v2  ;;  %v560_v25 = vand.u32 2139095040, %v2467_v32 }
  0xf7   :  { %v467_v19 = vand.u32 31, %v465_v16  ;;  %v408_v21 = vsel %vm406_vm4, %v407_v50, %v2448_v9  ;;  %v2464_v7 = vshrl.u32 %v306_v18, 30  ;;  %v460_v38 = vand.u32 8388607, %v3031_v22 }
  0xf8   :  { %v409_v33 = vadd.s32 %v408_v21, %v404_v20  ;;  %v209_v57 = vclz %v2028_v27  ;;  %v466_v46 = vshrl.u32 %v465_v16, 5  ;;  %v561_v55 = vshrl.u32 %v560_v25, 23 }
  0xf9   :  { %v468_v23 = vsub.s32 32, %v467_v19  ;;  %v308_v41 = vshll.u32 %v2464_v7, 30  ;;  %v470_v42 = vshll.u32 %v2191_v26, %v467_v19  ;;  %v473_v29 = vshll.u32 %v2192_v28, %v467_v19 }
  0xfa   :  { %v410_v35 = vadd.s32 536870912, %v409_v33  ;;  %v479_v30 = vshll.u32 %v2194_v34, %v467_v19  ;;  %v476_v49 = vshll.u32 %v2193_v31, %v467_v19  ;;  %v482_v60 = vshll.u32 %v2195_v37, %v467_v19 }
  0xfb   :  { %v471_v36 = vshrl.u32 %v2192_v28, %v468_v23  ;;  %v474_v39 = vshrl.u32 %v2193_v31, %v468_v23  ;;  %v477_v43 = vshrl.u32 %v2194_v34, %v468_v23  ;;  %v480_v44 = vshrl.u32 %v2195_v37, %v468_v23 }
  0xfc   :  { %v2479_v45 = vshrl.u32 %v410_v35, 30  ;;  %v483_v5 = vshrl.u32 %v2196_v40, %v468_v23  ;;  %v2029_v9 = vadd.s32 4294967294, %v209_v57  ;;  %v2484_v10 = vsub.s32 %v305_v59, %v308_v41 }
  0xfd   :  { %v472_v48 = vor.u32 %v471_v36, %v470_v42  ;;  %v475_v52 = vor.u32 %v474_v39, %v473_v29  ;;  %v481_v54 = vor.u32 %v480_v44, %v479_v30  ;;  %v478_v3 = vor.u32 %v477_v43, %v476_v49 }
  0xfe   :  { %v461_v12 = vor.u32 8388608, %v460_v38  ;;  %v484_v13 = vor.u32 %v483_v5, %v482_v60  ;;  %v412_v15 = vshll.u32 %v2479_v45, 30  ;;  %vm485_vm5 = vcmp.lt.s32.totalorder %v466_v46, 1 }
  0xff   :  { %vm488_vm6 = vcmp.lt.s32.totalorder %v466_v46, 4  ;;  %v469_v50 = vshrl.u32 %v2191_v26, %v468_v23  ;;  %vm487_vm7 = vcmp.lt.s32.totalorder %v466_v46, 3  ;;  %v493_v16 = vsel %vm485_vm5, %v472_v48, %v475_v52 }
 0x100   :  { %v494_v17 = vsel %vm488_vm6, %v481_v54, 920167782  ;;  %vm486_vm8 = vcmp.lt.s32.totalorder %v466_v46, 2  ;;  %v490_v18 = vsel %vm488_vm6, %v478_v3, 2102212464  ;;  %v497_v20 = vsel %vm485_vm5, %v475_v52, %v478_v3 }
 0x101   :  { %v495_v19 = vsel %vm487_vm7, %v478_v3, %v494_v17  ;;  %v1396_v59 = vpack.c.bf16 %v2267_v0, %v2267_v0  ;;  %v498_v27 = vsel %vm488_vm6, %v484_v13, 1326507024  ;;  %v501_v35 = vshll.u32 %v461_v12, 8 }
 0x102   :  { %v496_v21 = vsel %vm486_vm8, %v493_v16, %v495_v19  ;;  %v311_v36 = vsub.s32 0, %v2484_v10  ;;  %v2494_v38 = vsub.s32 %v409_v33, %v412_v15  ;;  %v489_v23 = vsel %vm485_vm5, %v469_v50, %v472_v48 }
 0x103   :  { %v499_v39 = vsel %vm487_vm7, %v481_v54, %v498_v27  ;;  %v491_v57 = vsel %vm487_vm7, %v475_v52, %v490_v18  ;;  %v2498_v42 = vmul.u32.u64.low %v501_v35, %v496_v21  ;;  %v2499_v43 = vmul.u32.u64.high %v501_v35, %v496_v21, %v2498_v42 }
 0x104   :  { %v500_v41 = vsel %vm486_vm8, %v497_v20, %v499_v39  ;;  %vm2030_vm9 = vcmp.lt.s32.totalorder %v2029_v9, 0  ;;  %v2043_v30 = vadd.s32 4294967169, %v561_v55  ;;  %v2032_v44 = vmin.u32 %v311_v36, %v2484_v10  ;;  %v2518_v55 = vpop.f32.mrf.mxu0 }
 0x105   :  { %v2502_v0 = vmul.u32.u64.low %v501_v35, %v500_v41  ;;  %v2503_v29 = vmul.u32.u64.high %v501_v35, %v500_v41, %v2502_v0  ;;  %v492_v33 = vsel %vm486_vm8, %v489_v23, %v491_v57  ;;  %vm3033_vm10 = vcmask 1043456  }
 0x106   :  { %v567_v25 = vadd.s32 1, %v2043_v30  ;;  %v2507_v48 = vsel %vm2030_vm9, 0, %v2029_v9  ;;  %v415_v49 = vsub.s32 0, %v2494_v38  ;;  %v511_v52 = vadd.s32 1, %v2499_v43  ;;  %2082 = vmatprep.subr.msk.bf16.mxu0 %vm3033_vm10, %v1396_v59 }
 0x107   :  { %v508_v54 = vmul.u32 %v501_v35, %v492_v33  ;;  %vm510_vm11 = vc.u32 %v2503_v29, %v2498_v42  ;;  %v3029_v60 = vand.u32 2147483647, %v2467_v32  ;;  %v217_v46 = vsub.s32 4294967266, %v2507_v48 }
 0x108   :  { %vm568_vm12 = vcmp.gt.s32.totalorder %v567_v25, 0  ;;  %v313_v5 = vclz %v2032_v44  ;;  %v512_v3 = vsel %vm510_vm11, %v511_v52, %v2499_v43  ;;  %v2036_v12 = vmin.u32 %v415_v49, %v2494_v38 }
 0x109   :  { %v569_v9 = vsel %vm568_vm12, %v567_v25, 0  ;;  %v513_v13 = vadd.s32 %v512_v3, %v508_v54  ;;  %v197_v50 = vadd.s32 %v2339_v63, %v2337_v62  ;;  %v213_v16 = vsub.s32 32, %v2507_v48 }
 0x10a   :  { %v571_v15 = vand.u32 31, %v569_v9  ;;  %v214_v17 = vshll.u32 %v2444_v2, %v2507_v48  ;;  %v218_v20 = vadd.s32 127, %v217_v46  ;;  %v2033_v59 = vadd.s32 4294967294, %v313_v5 }
 0x10b   :  { %v514_v18 = vadd.s32 536870912, %v513_v13  ;;  %v564_v21 = vand.u32 8388607, %v3029_v60  ;;  %v664_v27 = vand.u32 2139095040, %v2518_v55  ;;  %v417_v35 = vclz %v2036_v12 }
 0x10c   :  { %v572_v19 = vsub.s32 32, %v571_v15  ;;  %v574_v63 = vshll.u32 %v2191_v26, %v571_v15  ;;  %v577_v2 = vshll.u32 %v2192_v28, %v571_v15  ;;  %v570_v43 = vshrl.u32 %v569_v9, 5 }
 0x10d   :  { %v2528_v36 = vshrl.u32 %v514_v18, 30  ;;  %v580_v0 = vshll.u32 %v2193_v31, %v571_v15  ;;  %v583_v30 = vshll.u32 %v2194_v34, %v571_v15  ;;  %v665_v48 = vshrl.u32 %v664_v27, 23 }
 0x10e   :  { %v575_v23 = vshrl.u32 %v2192_v28, %v572_v19  ;;  %v578_v62 = vshrl.u32 %v2193_v31, %v572_v19  ;;  %v581_v39 = vshrl.u32 %v2194_v34, %v572_v19  ;;  %v584_v57 = vshrl.u32 %v2195_v37, %v572_v19 }
 0x10f   :  { %v516_v41 = vshll.u32 %v2528_v36, 30  ;;  %v587_v25 = vshrl.u32 %v2196_v40, %v572_v19  ;;  %v586_v46 = vshll.u32 %v2195_v37, %v571_v15  ;;  %v215_v5 = vshrl.u32 %v197_v50, %v213_v16 }
 0x110   :  { %v576_v44 = vor.u32 %v575_v23, %v574_v63  ;;  %v579_v33 = vor.u32 %v578_v62, %v577_v2  ;;  %v582_v52 = vor.u32 %v581_v39, %v580_v0  ;;  %v585_v54 = vor.u32 %v584_v57, %v583_v30 }
 0x111   :  { %v2540_v49 = vsub.s32 %v513_v13, %v516_v41  ;;  %v219_v3 = vshll.u32 %v218_v20, 23  ;;  %vm2034_vm13 = vcmp.lt.s32.totalorder %v2033_v59, 0  ;;  %v565_v12 = vor.u32 8388608, %v564_v21 }
 0x112   :  { %v2037_v9 = vadd.s32 4294967294, %v417_v35  ;;  %v588_v60 = vor.u32 %v587_v25, %v586_v46  ;;  %vm589_vm14 = vcmp.lt.s32.totalorder %v570_v43, 1  ;;  %v573_v23 = vshrl.u32 %v2191_v26, %v572_v19 }
 0x113   :  { %v519_v18 = vsub.s32 0, %v2540_v49  ;;  %vm592_vm15 = vcmp.lt.s32.totalorder %v570_v43, 4  ;;  %v597_v62 = vsel %vm589_vm14, %v576_v44, %v579_v33  ;;  %v2047_v27 = vadd.s32 4294967169, %v665_v48 }
 0x114   :  { %vm591_vm1 = vcmp.lt.s32.totalorder %v570_v43, 3  ;;  %v594_v63 = vsel %vm592_vm15, %v582_v52, 2102212464  ;;  %v598_v2 = vsel %vm592_vm15, %v585_v54, 920167782  ;;  %vm590_vm2 = vcmp.lt.s32.totalorder %v570_v43, 2 }
 0x115   :  { %v2040_v13 = vmin.u32 %v519_v18, %v2540_v49  ;;  %v599_v15 = vsel %vm591_vm1, %v582_v52, %v598_v2  ;;  %v601_v50 = vsel %vm589_vm14, %v579_v33, %v582_v52  ;;  %v605_v16 = vshll.u32 %v565_v12, 8 }
 0x116   :  { %v2546_v20 = vor.u32 %v215_v5, %v214_v17  ;;  %v593_v21 = vsel %vm589_vm14, %v573_v23, %v576_v44  ;;  %v600_v35 = vsel %vm590_vm2, %v597_v62, %v599_v15  ;;  %v602_v39 = vsel %vm592_vm15, %v588_v60, 1326507024 }
 0x117   :  { %v595_v57 = vsel %vm591_vm1, %v579_v33, %v594_v63  ;;  %v603_v19 = vsel %vm591_vm1, %v585_v54, %v602_v39  ;;  %v2549_v41 = vmul.u32.u64.low %v605_v16, %v600_v35  ;;  %v2550_v0 = vmul.u32.u64.high %v605_v16, %v600_v35, %v2549_v41 }
 0x118   :  { %v2554_v30 = vsel %vm2034_vm13, 0, %v2033_v59  ;;  %v521_v25 = vclz %v2040_v13  ;;  %v604_v48 = vsel %vm590_vm2, %v601_v50, %v603_v19  ;;  %v671_v52 = vadd.s32 1, %v2047_v27 }
 0x119   :  { %v2557_v46 = vor.u32 4788187, %v219_v3  ;;  %vm2038_vm3 = vcmp.lt.s32.totalorder %v2037_v9, 0  ;;  %v2559_v17 = vmul.u32.u64.low %v605_v16, %v604_v48  ;;  %v2560_v44 = vmul.u32.u64.high %v605_v16, %v604_v48, %v2559_v17 }
 0x11a   :  { %v596_v60 = vsel %vm590_vm2, %v593_v21, %v595_v57  ;;  %vm672_vm4 = vcmp.gt.s32.totalorder %v671_v52, 0  ;;  %v301_v33 = vadd.s32 %v2398_v58, %v2405_v61  ;;  %v321_v54 = vsub.s32 4294967266, %v2554_v30 }
 0x11b   :  { %v615_v59 = vadd.s32 1, %v2550_v0  ;;  %v673_v5 = vsel %vm672_vm4, %v671_v52, 0  ;;  %v223_v12 = vcvt.s32.f32 %v2546_v20  ;;  %v2568_v18 = vsel %vm2038_vm3, 0, %v2037_v9 }
 0x11c   :  { %v2041_v3 = vadd.s32 4294967294, %v521_v25  ;;  %v3030_v23 = vand.u32 2147483647, %v2518_v55  ;;  %v221_v62 = vand.u32 2147483647, %v2557_v46  ;;  %v612_v43 = vmul.u32 %v605_v16, %v596_v60 }
 0x11d   :  { %vm614_vm5 = vc.u32 %v2560_v44, %v2549_v41  ;;  %v675_v27 = vand.u32 31, %v673_v5  ;;  %v317_v58 = vsub.s32 32, %v2554_v30  ;;  %v318_v61 = vshll.u32 %v2484_v10, %v2554_v30 }
 0x11e   :  { %v405_v13 = vadd.s32 %v2447_v4, %v2454_v53  ;;  %v616_v9 = vsel %vm614_vm5, %v615_v59, %v2550_v0  ;;  %v322_v63 = vadd.s32 127, %v321_v54  ;;  %v425_v2 = vsub.s32 4294967266, %v2568_v18 }
 0x11f   :  { %v617_v15 = vadd.s32 %v616_v9, %v612_v43  ;;  %v676_v50 = vsub.s32 32, %v675_v27  ;;  %vm2042_vm6 = vcmp.lt.s32.totalorder %v2041_v3, 0  ;;  %v668_v16 = vand.u32 8388607, %v3030_v23 }
 0x120   :  { %v674_v21 = vshrl.u32 %v673_v5, 5  ;;  %v678_v35 = vshll.u32 %v2191_v26, %v675_v27  ;;  %v681_v19 = vshll.u32 %v2192_v28, %v675_v27  ;;  %v684_v53 = vshll.u32 %v2193_v31, %v675_v27 }
 0x121   :  { %v618_v39 = vadd.s32 536870912, %v617_v15  ;;  %v679_v57 = vshrl.u32 %v2192_v28, %v676_v50  ;;  %v682_v4 = vshrl.u32 %v2193_v31, %v676_v50  ;;  %v685_v0 = vshrl.u32 %v2194_v34, %v676_v50 }
 0x122   :  { %v687_v25 = vshll.u32 %v2194_v34, %v675_v27  ;;  %v688_v48 = vshrl.u32 %v2195_v37, %v676_v50  ;;  %v2591_v52 = vsel %vm2042_vm6, 0, %v2041_v3  ;;  %v690_v28 = vshll.u32 %v2195_v37, %v675_v27 }
 0x123   :  { %v2593_v17 = vshrl.u32 %v618_v39, 30  ;;  %v680_v60 = vor.u32 %v679_v57, %v678_v35  ;;  %v683_v54 = vor.u32 %v682_v4, %v681_v19  ;;  %v686_v59 = vor.u32 %v685_v0, %v684_v53 }
 0x124   :  { %v689_v5 = vor.u32 %v688_v48, %v687_v25  ;;  %v691_v43 = vshrl.u32 %v2196_v40, %v676_v50  ;;  %v319_v9 = vshrl.u32 %v301_v33, %v317_v58  ;;  %v323_v31 = vshll.u32 %v322_v63, 23 }
 0x125   :  { %v421_v23 = vsub.s32 32, %v2568_v18  ;;  %v620_v34 = vshll.u32 %v2593_v17, 30  ;;  %v426_v22 = vadd.s32 127, %v425_v2  ;;  %v669_v47 = vor.u32 8388608, %v668_v16 }
 0x126   :  { %v692_v3 = vor.u32 %v691_v43, %v690_v28  ;;  %vm693_vm7 = vcmp.lt.s32.totalorder %v674_v21, 1  ;;  %v529_v39 = vsub.s32 4294967266, %v2591_v52  ;;  %vm696_vm8 = vcmp.lt.s32.totalorder %v674_v21, 4 }
 0x127   :  { %v621_v35 = vsub.s32 %v617_v15, %v620_v34  ;;  %v701_v57 = vsel %vm693_vm7, %v680_v60, %v683_v54  ;;  %v677_v37 = vshrl.u32 %v2191_v26, %v676_v50  ;;  %vm695_vm9 = vcmp.lt.s32.totalorder %v674_v21, 3 }
 0x128   :  { %v698_v40 = vsel %vm696_vm8, %v686_v59, 2102212464  ;;  %v702_v33 = vsel %vm696_vm8, %v689_v5, 920167782  ;;  %vm694_vm11 = vcmp.lt.s32.totalorder %v674_v21, 2  ;;  %v705_v63 = vsel %vm693_vm7, %v683_v54, %v686_v59 }
 0x129   :  { %v623_v27 = vsub.s32 0, %v621_v35  ;;  %v703_v58 = vsel %vm695_vm9, %v686_v59, %v702_v33  ;;  %v427_v2 = vshll.u32 %v426_v22, 23  ;;  %v706_v19 = vsel %vm696_vm8, %v692_v3, 1326507024 }
 0x12a   :  { %v704_v16 = vsel %vm694_vm11, %v701_v57, %v703_v58  ;;  %v709_v4 = vshll.u32 %v669_v47, 8  ;;  %v697_v15 = vsel %vm693_vm7, %v677_v37, %v680_v60  ;;  %v699_v0 = vsel %vm695_vm9, %v683_v54, %v698_v40 }
 0x12b   :  { %v2044_v53 = vmin.u32 %v623_v27, %v621_v35  ;;  %v707_v25 = vsel %vm695_vm9, %v689_v5, %v706_v19  ;;  %v530_v48 = vadd.s32 127, %v529_v39  ;;  %v324_v43 = vor.u32 4788187, %v323_v31 }
 0x12c   :  { %v708_v26 = vsel %vm694_vm11, %v705_v63, %v707_v25  ;;  %v2606_v50 = vmul.u32.u64.low %v709_v4, %v704_v16  ;;  %v2607_v28 = vmul.u32.u64.high %v709_v4, %v704_v16, %v2606_v50  ;;  %v423_v57 = vshrl.u32 %v405_v13, %v421_v23 }
 0x12d   :  { %v625_v34 = vclz %v2044_v53  ;;  %v2610_v59 = vmul.u32.u64.low %v709_v4, %v708_v26  ;;  %v2611_v22 = vmul.u32.u64.high %v709_v4, %v708_v26, %v2610_v59  ;;  %v525_v47 = vsub.s32 32, %v2591_v52 }
 0x12e   :  { %v700_v3 = vsel %vm694_vm11, %v697_v15, %v699_v0  ;;  %v224_v60 = vmul.f32 %v223_v12, %v221_v62  ;;  %v320_v54 = vor.u32 %v319_v9, %v318_v61  ;;  %v422_v5 = vshll.u32 %v2494_v38, %v2568_v18 }
 0x12f   :  { %v2045_v31 = vadd.s32 4294967294, %v625_v34  ;;  %v428_v39 = vor.u32 4788187, %v427_v2  ;;  %v509_v23 = vadd.s32 %v2498_v42, %v2503_v29  ;;  %v531_v13 = vshll.u32 %v530_v48, 23 }
 0x130   :  { %v719_v21 = vadd.s32 1, %v2607_v28  ;;  %v325_v37 = vand.u32 2147483647, %v324_v43  ;;  %v716_v46 = vmul.u32 %v709_v4, %v700_v3  ;;  %vm718_vm13 = vc.u32 %v2611_v22, %v2606_v50 }
 0x131   :  { %vm2046_vm12 = vcmp.lt.s32.totalorder %v2045_v31, 0  ;;  %v424_v20 = vor.u32 %v423_v57, %v422_v5  ;;  %v527_v10 = vshrl.u32 %v509_v23, %v525_v47  ;;  %v613_v38 = vadd.s32 %v2549_v41, %v2560_v44 }
 0x132   :  { %v628_v30 = vsel %vm2046_vm12, 0, %v2045_v31  ;;  %v720_v12 = vsel %vm718_vm13, %v719_v21, %v2607_v28  ;;  %v327_v29 = vcvt.s32.f32 %v320_v54  ;;  %v429_v61 = vand.u32 2147483647, %v428_v39  ;;  %v2137_v31 = vld [vmem:[%s3018_s2 + $0x8] sm:$0xff]  }
 0x133   :  { %v629_v18 = vsub.s32 32, %v628_v30  ;;  %v633_v62 = vsub.s32 4294967266, %v628_v30  ;;  %v721_v42 = vadd.s32 %v720_v12, %v716_v46  ;;  %v526_v9 = vshll.u32 %v2540_v49, %v2591_v52 }
 0x134   :  { %v532_v40 = vor.u32 4788187, %v531_v13  ;;  %v630_v33 = vshll.u32 %v621_v35, %v628_v30  ;;  %v328_v2 = vmul.f32 %v327_v29, %v325_v37  ;;  %v431_v16 = vcvt.s32.f32 %v424_v20 }
 0x135   :  { %v631_v27 = vshrl.u32 %v613_v38, %v629_v18  ;;  %v634_v58 = vadd.s32 127, %v633_v62  ;;  %v722_v63 = vadd.s32 536870912, %v721_v42  ;;  %v528_v19 = vor.u32 %v527_v10, %v526_v9 }
 0x136   :  { %v225_v41 = vxor.u32 2147483648, %v224_v60  ;;  %v432_v44 = vmul.f32 %v431_v16, %v429_v61  ;;  %v533_v0 = vand.u32 2147483647, %v532_v40  ;;  %v329_v26 = vxor.u32 2147483648, %v328_v2  ;;  %v2135_v16 = vld [vmem:[%s3018_s2] sm:$0xff]  }
 0x137   :  { %v632_v4 = vor.u32 %v631_v27, %v630_v33  ;;  %v635_v53 = vshll.u32 %v634_v58, 23  ;;  %v2634_v15 = vshrl.u32 %v722_v63, 30  ;;  %v535_v49 = vcvt.s32.f32 %v528_v19 }
 0x138   :  { %vm143_vm14 = vcmp.lt.s32.totalorder %v2288_v6, 0  ;;  %v433_v34 = vxor.u32 2147483648, %v432_v44  ;;  %vm247_vm15 = vcmp.lt.s32.totalorder %v2291_v8, 0  ;;  %vm2643_vm1 = vcmp.le.f32.partialorder %v141_v11, 0.7853982 }
 0x139   :  { %v636_v25 = vor.u32 4788187, %v635_v53  ;;  %v724_v48 = vshll.u32 %v2634_v15, 30  ;;  %v639_v35 = vcvt.s32.f32 %v632_v4  ;;  %v226_v43 = vsel %vm143_vm14, %v225_v41, %v224_v60 }
 0x13a   :  { %v536_v59 = vmul.f32 %v535_v49, %v533_v0  ;;  %v330_v54 = vsel %vm247_vm15, %v329_v26, %v328_v2  ;;  %v229_v5 = vsel %vm2643_vm1, %v2288_v6, %v226_v43  ;;  %vm351_vm2 = vcmp.lt.s32.totalorder %v2295_v14, 0 }
 0x13b   :  { %v637_v52 = vand.u32 2147483647, %v636_v25  ;;  %v725_v28 = vsub.s32 %v721_v42, %v724_v48  ;;  %vm2655_vm3 = vcmp.le.f32.partialorder %v245_v51, 0.7853982  ;;  %v434_v11 = vsel %vm351_vm2, %v433_v34, %v432_v44  ;;  %v1640_v44 = vld [vmem:[%s3021_s5] sm:$0xff] }
 0x13c   :  { %v537_v39 = vxor.u32 2147483648, %v536_v59  ;;  %v333_v23 = vsel %vm2655_vm3, %v2291_v8, %v330_v54  ;;  %v1395_v37 = vpack.c.bf16 %v2272_v1, %v2272_v1  ;;  %2144 = vcosq.f32 %v229_v5  ;;  %v1952_v1 = vld [vmem:[%s3027_s11] sm:$0xff] }
 0x13d   :  { %v640_v57 = vmul.f32 %v639_v35, %v637_v52  ;;  %v727_v47 = vsub.s32 0, %v725_v28  ;;  %v3038_v46 = vand.u32 2147483647, %v2295_v14  ;;  %2146 = vsinq.f32 %v229_v5 }
 0x13e   :  { %vm455_vm5 = vcmp.lt.s32.totalorder %v2396_v56, 0  ;;  %2148 = vcosq.f32 %v333_v23  ;;  %v3041_v30 = vand.u32 2147483647, %v2396_v56  ;;  %vm559_vm7 = vcmp.lt.s32.totalorder %v2467_v32, 0 }
 0x13f   :  { %v2048_v60 = vmin.u32 %v727_v47, %v725_v28  ;;  %v641_v13 = vxor.u32 2147483648, %v640_v57  ;;  %vm2668_vm4 = vcmp.le.f32.partialorder %v3038_v46, 0.7853982  ;;  %v538_v12 = vsel %vm455_vm5, %v537_v39, %v536_v59  ;;  %v1706_v39 = vld [vmem:[%s3023_s7 + $0x10] sm:$0xff] }
 0x140   :  { %v437_v20 = vsel %vm2668_vm4, %v2295_v14, %v434_v11  ;;  %vm2678_vm6 = vcmp.le.f32.partialorder %v3041_v30, 0.7853982  ;;  %v227_v38 = vsub.s32 4, %v2421_v24  ;;  %2150 = vsinq.f32 %v333_v23 }
 0x141   :  { %v729_v21 = vclz %v2048_v60  ;;  %v642_v18 = vsel %vm559_vm7, %v641_v13, %v640_v57  ;;  %v331_v62 = vsub.s32 4, %v2464_v7  ;;  %2152 = vcosq.f32 %v437_v20 }
 0x142   :  { %v3044_v42 = vand.u32 2147483647, %v2467_v32  ;;  %v541_v9 = vsel %vm2678_vm6, %v2396_v56, %v538_v12  ;;  %v717_v40 = vadd.s32 %v2606_v50, %v2611_v22  ;;  %2154 = vsinq.f32 %v437_v20  ;;  %v1642_v50 = vld [vmem:[%s3021_s5 + $0x10] sm:$0xff] }
 0x143   :  { %v2049_v10 = vadd.s32 4294967294, %v729_v21  ;;  %v643_v58 = vsub.s32 4, %v2593_v17  ;;  %v1495_v2 = vsel %vm3033_vm10, %v1395_v37, 0  ;;  %v332_v22 = vsel %vm247_vm15, %v331_v62, %v2464_v7 }
 0x144   :  { %vm2691_vm9 = vcmp.le.f32.partialorder %v3044_v42, 0.7853982  ;;  %1515 = vmatpush1.bf16.msra.mxu0 %v1495_v2  ;;  %2156 = vcosq.f32 %v541_v9  ;;  %v2197_v41 = vmov 0   ;;  %v539_v0 = vsub.s32 4, %v2528_v36 }
 0x145   :  { %vm2050_vm8 = vcmp.lt.s32.totalorder %v2049_v10, 0  ;;  %v645_v63 = vsel %vm2691_vm9, %v2467_v32, %v642_v18  ;;  %1457 = vmatprep.mubr.bf16.mxu1 %v2197_v41  ;;  %1532 = vmatprep.mubr.bf16.mxu0 %v2197_v41  ;;  %v435_v7 = vsub.s32 4, %v2479_v45  ;;  %v644_v26 = vsel %vm559_vm7, %v643_v58, %v2593_v17  ;;  %v1641_v17 = vld [vmem:[%s3021_s5 + $0x8] sm:$0xff] }
 0x146   :  { %v732_v61 = vsel %vm2050_vm8, 0, %v2049_v10  ;;  %2158 = vcosq.f32 %v645_v63  ;;  %2132 = vset.pattern.permute.xlu0 %v2197_v41  ;;  %2133 = vset.pattern.permute.xlu1 %v2197_v41  ;;  %v228_v49 = vsel %vm143_vm14, %v227_v38, %v2421_v24  ;;  %v334_v52 = vsel %vm2655_vm3, 0, %v332_v22  ;;  %v1705_v58 = vld [vmem:[%s3023_s7 + $0x8] sm:$0xff] }
 0x147   :  { %v733_v33 = vsub.s32 32, %v732_v61  ;;  %v737_v27 = vsub.s32 4294967266, %v732_v61  ;;  %v734_v19 = vshll.u32 %v725_v28, %v732_v61  ;;  %2160 = vsinq.f32 %v645_v63  ;;  %2083 = vmatmul.mubr.msk.bf16.vlgmr.msra.gmra.mxu0 %vm48_vm0, %v2135_v16  ;;  %1656 = vperm.xlu0 %2132, %v1642_v50   ;;  %v1643_v28 = vld [vmem:[%s3021_s5 + $0x18] sm:$0xff]  ;;  %v1704_v61 = vld [vmem:[%s3023_s7] sm:$0xff] }
 0x148   :  { %2162 = vsinq.f32 %v541_v9  ;;  %1542 = vmatprep.mubr.bf16.mxu0 %v2197_v41  ;;  %1646 = vperm.xlu1 %2133, %v1640_v44   ;;  %v540_v24 = vsel %vm455_vm5, %v539_v0, %v2528_v36  ;;  %v646_v34 = vsel %vm2691_vm9, 0, %v644_v26  ;;  %v230_v54 = vsel %vm2643_vm1, 0, %v228_v49  ;;  %v1832_v0 = vld [vmem:[%s3025_s9 + $0x10] sm:$0xff]  ;;  %v1833_v26 = vld [vmem:[%s3025_s9 + $0x18] sm:$0xff] }
 0x149   :  { %v735_v4 = vshrl.u32 %v717_v40, %v733_v33  ;;  %v738_v53 = vadd.s32 127, %v737_v27  ;;  %v2739_v43 = vpop.eup %2144  ;;  %v338_v5 = vadd.s32 3, %v334_v52  ;;  %v436_v60 = vsel %vm351_vm2, %v435_v7, %v2479_v45  ;;  %v1707_v45 = vld [vmem:[%s3023_s7 + $0x18] sm:$0xff]  ;;  %s2016_s7 = sshll.u32 %s2198_s28, 4  ;;  %s2017_s7 = int_to_ptr.vmem [resolvable:$true] %s2016_s7 }
 0x14a   :  { %v2746_v47 = vpop.eup %2146  ;;  %v542_v23 = vsel %vm2678_vm6, 0, %v540_v24  ;;  %v650_v13 = vadd.s32 3, %v646_v34  ;;  %v234_v37 = vadd.s32 3, %v230_v54  ;;  %v438_v46 = vsel %vm2668_vm4, 0, %v436_v60  ;;  %v1830_v60 = vld [vmem:[%s3025_s9] sm:$0xff]  ;;  %p2173_p1 = scmp.lt.s32.totalorder %s2017_s7, %s2017_s7 }
 0x14b   :  { %v736_v25 = vor.u32 %v735_v4, %v734_v19  ;;  %v739_v48 = vshll.u32 %v738_v53, 23  ;;  %1661 = vperm.xlu0 %2132, %v1643_v28   ;;  %v2756_v36 = vpop.eup %2148  ;;  %v747_v10 = vsub.s32 4, %v2634_v15  ;;  %v2773_v30 = vand.u32 3, %v230_v54 }
 0x14c   :  { %1651 = vperm.xlu1 %2133, %v1641_v17   ;;  %v3047_v12 = vand.u32 2147483647, %v2518_v55  ;;  %vm663_vm12 = vcmp.lt.s32.totalorder %v2518_v55, 0  ;;  %v339_v38 = vand.u32 3, %v338_v5  ;;  %v546_v51 = vadd.s32 3, %v542_v23 }
 0x14d   :  { %v740_v35 = vor.u32 4788187, %v739_v48  ;;  %v743_v57 = vcvt.s32.f32 %v736_v25  ;;  %v2761_v3 = vpop.eup %2150  ;;  %v345_v29 = vxor.u32 2147483648, %v2756_v36  ;;  %v2793_v9 = vand.u32 3, %v334_v52 }
 0x14e   :  { %v2768_v21 = vpop.eup %2152  ;;  %vm2777_vm11 = vcmp.le.f32.partialorder %v3047_v12, 0.7853982  ;;  %v342_v42 = vxor.u32 2147483648, %v2761_v3  ;;  %v442_v40 = vadd.s32 3, %v438_v46  ;;  %v2798_v27 = vand.u32 3, %v650_v13 }
 0x14f   :  { %v741_v59 = vand.u32 2147483647, %v740_v35  ;;  %2084 = vmatmul.mubr.msk.bf16.gmra.mxu0 %vm48_vm0, %v2137_v31  ;;  %1720 = vperm.xlu0 %2132, %v1706_v39   ;;  %v2783_v18 = vpop.eup %2154  ;;  %v2805_v2 = vand.u32 3, %v438_v46  ;;  %v2807_v16 = vand.u32 3, %v542_v23  ;;  %v748_v19 = vsel %vm663_vm12, %v747_v10, %v2634_v15  ;;  %v1831_v31 = vld [vmem:[%s3025_s9 + $0x8] sm:$0xff] }
 0x150   :  { %1725 = vperm.xlu1 %2133, %v1707_v45   ;;  %1777 = vmatprep.mubr.bf16.mxu0 %v2197_v41  ;;  %vm340_vm0 = vcmp.lt.s32.totalorder %v339_v38, 2  ;;  %vm341_vm13 = vcmp.eq.s32.totalorder %v339_v38, 0  ;;  %vm344_vm14 = vcmp.eq.s32.totalorder %v339_v38, 2  ;;  %v2816_v50 = vand.u32 3, %v646_v34 }
 0x151   :  { %v744_v11 = vmul.f32 %v743_v57, %v741_v59  ;;  %v2803_v63 = vpop.eup %2156  ;;  %v343_v22 = vsel %vm341_vm13, %v2756_v36, %v342_v42  ;;  %v346_v15 = vsel %vm344_vm14, %v345_v29, %v2761_v3  ;;  %v547_v44 = vand.u32 3, %v546_v51 }
 0x152   :  { %v750_v48 = vsel %vm2777_vm11, 0, %v748_v19  ;;  %vm652_vm15 = vcmp.lt.s32.totalorder %v2798_v27, 2  ;;  %vm653_vm1 = vcmp.eq.s32.totalorder %v2798_v27, 0  ;;  %vm337_vm2 = vweird.f32 %v2291_v8  ;;  %v2136_v8 = vld [vmem:[%s3019_s3 + $0x8] sm:$0xff]  }
 0x153   :  { %v745_v20 = vxor.u32 2147483648, %v744_v11  ;;  %v2812_v4 = vpop.eup %2158  ;;  %1710 = vperm.xlu0 %2132, %v1704_v61   ;;  %v235_v7 = vand.u32 3, %v234_v37  ;;  %v553_v49 = vxor.u32 2147483648, %v2803_v63  ;;  %v238_v52 = vxor.u32 2147483648, %v2746_v47 }
 0x154   :  { %v2814_v53 = vpop.eup %2160  ;;  %1715 = vperm.xlu1 %2133, %v1705_v58   ;;  %v241_v35 = vxor.u32 2147483648, %v2739_v43  ;;  %v443_v28 = vand.u32 3, %v442_v40  ;;  %vm656_vm3 = vcmp.eq.s32.totalorder %v2798_v27, 2  ;;  %v657_v24 = vxor.u32 2147483648, %v2812_v4 }
 0x155   :  { %v746_v62 = vsel %vm663_vm12, %v745_v20, %v744_v11  ;;  %v2827_v25 = vpop.eup %2162  ;;  %v654_v17 = vxor.u32 2147483648, %v2814_v53  ;;  %v446_v34 = vxor.u32 2147483648, %v2783_v18  ;;  %v754_v59 = vadd.s32 3, %v750_v48 }
 0x156   :  { %v749_v33 = vsel %vm2777_vm11, %v2518_v55, %v746_v62  ;;  %vm649_vm4 = vweird.f32 %v2467_v32  ;;  %v347_v57 = vsel %vm340_vm0, %v343_v22, %v346_v15  ;;  %v550_v54 = vxor.u32 2147483648, %v2827_v25 }
 0x157   :  { %2164 = vcosq.f32 %v749_v33  ;;  %1846 = vperm.xlu0 %2132, %v1832_v0   ;;  %v449_v5 = vxor.u32 2147483648, %v2768_v21  ;;  %vm545_vm5 = vweird.f32 %v2396_v56  ;;  %vm549_vm6 = vcmp.eq.s32.totalorder %v547_v44, 0 }
 0x158   :  { %2166 = vsinq.f32 %v749_v33  ;;  %1851 = vperm.xlu1 %2133, %v1833_v26   ;;  %vm552_vm7 = vcmp.eq.s32.totalorder %v547_v44, 2  ;;  %vm237_vm8 = vcmp.eq.s32.totalorder %v235_v7, 0  ;;  %vm240_vm9 = vcmp.eq.s32.totalorder %v235_v7, 2 }
 0x159   :  { %v554_v11 = vsel %vm552_vm7, %v553_v49, %v2827_v25  ;;  %v239_v39 = vsel %vm237_vm8, %v2739_v43, %v238_v52  ;;  %v242_v23 = vsel %vm240_vm9, %v241_v35, %v2746_v47  ;;  %vm445_vm11 = vcmp.eq.s32.totalorder %v443_v28, 0 }
 0x15a   :  { %v655_v13 = vsel %vm653_vm1, %v2812_v4, %v654_v17  ;;  %v658_v45 = vsel %vm656_vm3, %v657_v24, %v2814_v53  ;;  %vm233_vm12 = vweird.f32 %v2288_v6  ;;  %v447_v37 = vsel %vm445_vm11, %v2768_v21, %v446_v34  ;;  %v2139_v6 = vld [vmem:[%s3020_s4 + $0x8] sm:$0xff]  }
 0x15b   :  { %vm448_vm0 = vcmp.eq.s32.totalorder %v443_v28, 2  ;;  %1836 = vperm.xlu0 %2132, %v1830_v60   ;;  %vm753_vm13 = vweird.f32 %v2518_v55  ;;  %v755_v46 = vand.u32 3, %v754_v59  ;;  %v1377_v20 = vand.u32 3, %v750_v48 }
 0x15c   :  { %v551_v10 = vsel %vm549_vm6, %v2803_v63, %v550_v54  ;;  %v450_v12 = vsel %vm448_vm0, %v449_v5, %v2783_v18  ;;  %1841 = vperm.xlu1 %2133, %v1831_v31   ;;  %vm1276_vm1 = vcmp.eq.s32.totalorder %v2816_v50, 0  ;;  %vm1279_vm3 = vcmp.eq.s32.totalorder %v2816_v50, 2 }
 0x15d   :  { %vm548_vm7 = vcmp.lt.s32.totalorder %v547_v44, 2  ;;  %v659_v38 = vsel %vm652_vm15, %v655_v13, %v658_v45  ;;  %v348_v51 = vsel %vm337_vm2, nan, %v347_v57  ;;  %vm236_vm6 = vcmp.lt.s32.totalorder %v235_v7, 2 }
 0x15e   :  { %vm444_vm8 = vcmp.lt.s32.totalorder %v443_v28, 2  ;;  %v555_v61 = vsel %vm548_vm7, %v551_v10, %v554_v11  ;;  %v243_v40 = vsel %vm236_vm6, %v239_v39, %v242_v23  ;;  %vm441_vm9 = vweird.f32 %v2295_v14  ;;  %v2138_v14 = vld [vmem:[%s3020_s4] sm:$0xff]  }
 0x15f   :  { %v451_v33 = vsel %vm444_vm8, %v447_v37, %v450_v12  ;;  %1955 = vperm.xlu0 %2132, %v1952_v1   ;;  %vm756_vm11 = vcmp.lt.s32.totalorder %v755_v46, 2  ;;  %vm1379_vm0 = vcmp.eq.s32.totalorder %v1377_v20, 0  ;;  %vm1382_vm10 = vcmp.eq.s32.totalorder %v1377_v20, 2 }
 0x160   :  { %vm757_vm14 = vcmp.eq.s32.totalorder %v755_v46, 0  ;;  %vm760_vm15 = vcmp.eq.s32.totalorder %v755_v46, 2  ;;  %v660_v22 = vsel %vm649_vm4, nan, %v659_v38  ;;  %v1281_v44 = vsel %vm1279_vm3, %v657_v24, %v2814_v53 }
 0x161   :  { %v556_v0 = vsel %vm545_vm5, nan, %v555_v61  ;;  %v452_v48 = vsel %vm441_vm9, nan, %v451_v33  ;;  %v1278_v59 = vsel %vm1276_vm1, %v2812_v4, %v654_v17  ;;  %vm1378_vm7 = vcmp.lt.s32.totalorder %v1377_v20, 2 }
 0x162   :  { %v767_v60 = vpack.c.bf16 %v660_v22, %v660_v22  ;;  %v244_v24 = vsel %vm233_vm12, nan, %v243_v40  ;;  %v766_v11 = vpack.c.bf16 %v556_v0, %v348_v51  ;;  %vm1176_vm1 = vcmp.eq.s32.totalorder %v2807_v16, 2 }
 0x163   :  { %v765_v39 = vpack.c.bf16 %v452_v48, %v244_v24  ;;  %vm1070_vm3 = vcmp.eq.s32.totalorder %v2805_v2, 0  ;;  %vm967_vm6 = vcmp.eq.s32.totalorder %v2793_v9, 0  ;;  %v1178_v17 = vsel %vm1176_vm1, %v553_v49, %v2827_v25 }
 0x164   :  { %v2165_v62 = vpop.eup %2164  ;;  %vm3051_vm8 = vcmask 1043456   ;;  %v1072_v55 = vsel %vm1070_vm3, %v2768_v21, %v446_v34  ;;  %v2134_v21 = vld [vmem:[%s3019_s3] sm:$0xff]   ;;  %vm1411_vm1 = vcmask 195584   ;;  %vm863_vm3 = vcmp.lt.s32.totalorder %v2773_v30, 2 }
 0x165   :  { %v2167_v58 = vpop.eup %2166  ;;  %v761_v19 = vxor.u32 2147483648, %v2165_v62 }
 0x166   :  { %v758_v27 = vxor.u32 2147483648, %v2167_v58 }
 0x167   :  { %v762_v15 = vsel %vm760_vm15, %v761_v19, %v2167_v58  ;;  %v1384_v28 = vsel %vm1382_vm10, %v761_v19, %v2167_v58  ;;  %vm1173_vm10 = vcmp.eq.s32.totalorder %v2807_v16, 0  ;;  %vm970_vm15 = vcmp.eq.s32.totalorder %v2793_v9, 2 }
 0x168   :  { %v759_v7 = vsel %vm757_vm14, %v2165_v62, %v758_v27  ;;  %v1381_v26 = vsel %vm1379_vm0, %v2165_v62, %v758_v27  ;;  %vm3050_vm14 = vcmp.lt.s32.totalorder %v2816_v50, 2  ;;  %v1175_v4 = vsel %vm1173_vm10, %v2803_v63, %v550_v54 }
 0x169   :  { %v763_v57 = vsel %vm756_vm11, %v759_v7, %v762_v15  ;;  %v1385_v53 = vsel %vm1378_vm7, %v1381_v26, %v1384_v28  ;;  %v1282_v13 = vsel %vm3050_vm14, %v1278_v59, %v1281_v44  ;;  %vm3052_vm11 = vmmov %vm3051_vm8  ;;  %vm1073_vm0 = vcmp.eq.s32.totalorder %v2805_v2, 2 }
 0x16a   :  { %v764_v31 = vsel %vm753_vm13, nan, %v763_v57  ;;  %v1420_v45 = vsel %vm3052_vm11, %v767_v60, 0  ;;  %v969_v50 = vsel %vm967_vm6, %v2756_v36, %v342_v42  ;;  %v1386_v37 = vsel %vm753_vm13, nan, %v1385_v53  ;;  %vm3053_vm6 = vmmov %vm3051_vm8 }
 0x16b   :  { %v768_v23 = vpack.c.bf16 %v764_v31, %v764_v31  ;;  %v1283_v54 = vsel %vm649_vm4, nan, %v1282_v13  ;;  %v972_v63 = vsel %vm970_vm15, %v345_v29, %v2761_v3  ;;  %vm1172_vm7 = vcmp.lt.s32.totalorder %v2807_v16, 2 }
 0x16c   :  { %vm864_vm10 = vcmp.eq.s32.totalorder %v2773_v30, 0  ;;  %v1075_v32 = vsel %vm1073_vm0, %v449_v5, %v2783_v18  ;;  %v1179_v42 = vsel %vm1172_vm7, %v1175_v4, %v1178_v17  ;;  %vm867_vm4 = vcmp.eq.s32.totalorder %v2773_v30, 2 }
 0x16d   :  { %2077 = vmatprep.subr.msk.bf16.mxu1 %vm3051_vm8, %v768_v23  ;;  %v866_v36 = vsel %vm864_vm10, %v2739_v43, %v238_v52  ;;  %vm1069_vm13 = vcmp.lt.s32.totalorder %v2805_v2, 2  ;;  %vm966_vm14 = vcmp.lt.s32.totalorder %v2793_v9, 2  ;;  %v1390_v3 = vpack.c.bf16 %v1386_v37, %v1386_v37  ;;  %vm3054_vm8 = vmmov %vm3053_vm6 }
 0x16e   :  { %1438 = vmatpush1.bf16.msra.mxu1 %v1420_v45  ;;  %v1389_v29 = vpack.c.bf16 %v1283_v54, %v1283_v54  ;;  %v869_v16 = vsel %vm867_vm4, %v241_v35, %v2746_v47  ;;  %v973_v18 = vsel %vm966_vm14, %v969_v50, %v972_v63  ;;  %v1076_v25 = vsel %vm1069_vm13, %v1072_v55, %v1075_v32 }
 0x16f   :  { %1439 = vmatprep.subr.bf16.mxu1 %v766_v11  ;;  %v1180_v49 = vsel %vm545_vm5, nan, %v1179_v42  ;;  %v870_v9 = vsel %vm863_vm3, %v866_v36, %v869_v16  ;;  %v974_v43 = vsel %vm337_vm2, nan, %v973_v18  ;;  %v1077_v47 = vsel %vm441_vm9, nan, %v1076_v25 }
 0x170   :  { %v1574_v2 = vsel %vm3054_vm8, %v1389_v29, 0  ;;  %v1388_v52 = vpack.c.bf16 %v1180_v49, %v974_v43  ;;  %v871_v56 = vsel %vm233_vm12, nan, %v870_v9  ;;  %vm1738_vm10 = vcmask 261120  }
 0x171   :  { %v1387_v30 = vpack.c.bf16 %v1077_v47, %v871_v56 }
 0x172   :  { %1440 = vmatpush1.bf16.msra.mxu1 %v765_v39 }
 0x173   :  { %2087 = vmatprep.subr.msk.bf16.mxu1 %vm3053_vm6, %v1390_v3 }
 0x175   :  { %2078 = vmatmul.mubr.msk.bf16.vlgmr.msra.gmra.mxu1 %vm1411_vm1, %v2134_v21 }
 0x176   :  { %1592 = vmatpush1.bf16.msra.mxu1 %v1574_v2  ;;  %1467 = vmatprep.mubr.bf16.mxu1 %v2197_v41 }
 0x177   :  { %1593 = vmatprep.subr.bf16.mxu1 %v1388_v52 }
 0x17a   :  { %1594 = vmatpush1.bf16.msra.mxu1 %v1387_v30 }
 0x17d   :  { %2079 = vmatmul.mubr.msk.bf16.gmra.mxu1 %vm1411_vm1, %v2136_v8 }
 0x17e   :  { %1611 = vmatprep.mubr.bf16.mxu1 %v2197_v41 }
 0x185   :  { %2088 = vmatmul.mubr.msk.bf16.vlgmr.msra.gmra.mxu1 %vm1411_vm1, %v2138_v14 }
 0x186   :  { %1621 = vmatprep.mubr.bf16.mxu1 %v2197_v41 }
 0x18d   :  { %2089 = vmatmul.mubr.msk.bf16.gmra.mxu1 %vm1411_vm1, %v2139_v6 }
 0x18e   :  { %1902 = vmatprep.mubr.bf16.mxu1 %v2197_v41 }
 0x1c2   :  { %v1657_v0 = vpop.permute.xlu0 %1656 }
 0x1c3   :  { %v1647_v15 = vpop.permute.xlu1 %1646 }
 0x1c6   :  { %v1662_v37 = vpop.permute.xlu0 %1661 }
 0x1c7   :  { %v1652_v17 = vpop.permute.xlu1 %1651 }
 0x207   :  { %v1534_v35 = vpop.f32.mrf.mxu0 }
 0x209   :  { %v1536_v46 = vpop.f32.mrf.mxu0 }
 0x20b   :  { %v1538_v12 = vpop.f32.mrf.mxu0 }
 0x20d   :  { %v1540_v51 = vpop.f32.mrf.mxu0 }
 0x20f   :  { %v1544_v40 = vpop.f32.mrf.mxu0 }
 0x211   :  { %v1546_v19 = vpop.f32.mrf.mxu0 }
 0x213   :  { %v1548_v44 = vpop.f32.mrf.mxu0 }
 0x215   :  { %v1550_v11 = vpop.f32.mrf.mxu0 }
 0x235   :  { %v1459_v34 = vpop.f32.mrf.mxu1 }
 0x236   :  { %v1535_v4 = vadd.f32 %v1534_v35, %v1459_v34 }
 0x237   :  { %v1461_v5 = vpop.f32.mrf.mxu1 }
 0x238   :  { %v1537_v59 = vadd.f32 %v1536_v46, %v1461_v5 }
 0x239   :  { %v1463_v20 = vpop.f32.mrf.mxu1 }
 0x23a   :  { %v1539_v24 = vadd.f32 %v1538_v12, %v1463_v20 }
 0x23b   :  { %v1465_v10 = vpop.f32.mrf.mxu1 }
 0x23c   :  { %v1541_v48 = vadd.f32 %v1540_v51, %v1465_v10  ;;  %v2140_v51 = vld [vmem:[%s3022_s6] sm:$0xff]  }
 0x23d   :  { %v1469_v1 = vpop.f32.mrf.mxu1 }
 0x23e   :  { %v1545_v26 = vadd.f32 %v1544_v40, %v1469_v1 }
 0x23f   :  { %v1471_v38 = vpop.f32.mrf.mxu1 }
 0x240   :  { %v1547_v28 = vadd.f32 %v1546_v19, %v1471_v38  ;;  %v1721_v19 = vpop.permute.xlu0 %1720 }
 0x241   :  { %v1473_v62 = vpop.f32.mrf.mxu1 }
 0x242   :  { %v1549_v31 = vadd.f32 %v1548_v44, %v1473_v62  ;;  %v2141_v62 = vld [vmem:[%s3022_s6 + $0x8] sm:$0xff]  }
 0x243   :  { %v1475_v61 = vpop.f32.mrf.mxu1 }
 0x244   :  { %v1551_v54 = vadd.f32 %v1550_v11, %v1475_v61 }
 0x245   :  { %v1613_v33 = vpop.f32.mrf.mxu1 }
 0x246   :  { %v1632_v42 = vadd.f32 %v1613_v33, %v1535_v4  ;;  %v1726_v33 = vpop.permute.xlu1 %1725 }
 0x247   :  { %v1615_v58 = vpop.f32.mrf.mxu1 }
 0x248   :  { %v1633_v53 = vadd.f32 %v1615_v58, %v1537_v59  ;;  %v1664_v43 = vadd.f32 %v1647_v15, %v1632_v42 }
 0x249   :  { %v1617_v27 = vpop.f32.mrf.mxu1 }
 0x24a   :  { %v1634_v45 = vadd.f32 %v1617_v27, %v1539_v24  ;;  %v1665_v29 = vadd.f32 %v1647_v15, %v1633_v53  ;;  %v1680_v35 = vmul.f32 0.01, %v1664_v43  ;;  %vm1672_vm7 = vcmp.gt.f32.partialorder %v1664_v43, 0.0  ;;  %v1716_v15 = vpop.permute.xlu1 %1715 }
 0x24b   :  { %v1619_v22 = vpop.f32.mrf.mxu1 }
 0x24c   :  { %v1635_v57 = vadd.f32 %v1619_v22, %v1541_v48  ;;  %v1666_v21 = vadd.f32 %v1652_v17, %v1634_v45  ;;  %v1681_v2 = vmul.f32 0.01, %v1665_v29  ;;  %vm1673_vm0 = vcmp.gt.f32.partialorder %v1665_v29, 0.0 }
 0x24d   :  { %v1623_v7 = vpop.f32.mrf.mxu1  ;;  %v1688_v1 = vsel %vm1672_vm7, %v1664_v43, %v1680_v35 }
 0x24e   :  { %v1636_v39 = vadd.f32 %v1623_v7, %v1545_v26  ;;  %v1667_v63 = vadd.f32 %v1652_v17, %v1635_v57  ;;  %v1682_v56 = vmul.f32 0.01, %v1666_v21  ;;  %vm1674_vm15 = vcmp.gt.f32.partialorder %v1666_v21, 0.0  ;;  %v1711_v7 = vpop.permute.xlu0 %1710 }
 0x24f   :  { %v1625_v60 = vpop.f32.mrf.mxu1  ;;  %v1689_v20 = vsel %vm1673_vm0, %v1665_v29, %v1681_v2 }
 0x250   :  { %v1637_v23 = vadd.f32 %v1625_v60, %v1547_v28  ;;  %v1668_v36 = vadd.f32 %v1657_v0, %v1636_v39  ;;  %v1683_v25 = vmul.f32 0.01, %v1667_v63  ;;  %vm1675_vm5 = vcmp.gt.f32.partialorder %v1667_v63, 0.0 }
 0x251   :  { %v1627_v13 = vpop.f32.mrf.mxu1  ;;  %v1690_v10 = vsel %vm1674_vm15, %v1666_v21, %v1682_v56 }
 0x252   :  { %v1638_v50 = vadd.f32 %v1627_v13, %v1549_v31  ;;  %v1669_v55 = vadd.f32 %v1657_v0, %v1637_v23  ;;  %v1684_v47 = vmul.f32 0.01, %v1668_v36  ;;  %vm1676_vm9 = vcmp.gt.f32.partialorder %v1668_v36, 0.0 }
 0x253   :  { %v1629_v32 = vpop.f32.mrf.mxu1  ;;  %v1691_v6 = vsel %vm1675_vm5, %v1667_v63, %v1683_v25  ;;  %v1696_v38 = vpack.c.bf16 %v1690_v10, %v1688_v1  ;;  %v2142_v25 = vld [vmem:[%s3024_s8] sm:$0xff]  }
 0x254   :  { %v1670_v3 = vadd.f32 %v1662_v37, %v1638_v50  ;;  %v1639_v16 = vadd.f32 %v1629_v32, %v1551_v54  ;;  %v1685_v49 = vmul.f32 0.01, %v1669_v55  ;;  %vm1677_vm12 = vcmp.gt.f32.partialorder %v1669_v55, 0.0 }
 0x255   :  { %v1692_v34 = vsel %vm1676_vm9, %v1668_v36, %v1684_v47  ;;  %v1697_v12 = vpack.c.bf16 %v1691_v6, %v1689_v20  ;;  %v1852_v47 = vpop.permute.xlu1 %1851 }
 0x256   :  { %v1686_v18 = vmul.f32 0.01, %v1670_v3  ;;  %vm1678_vm2 = vcmp.gt.f32.partialorder %v1670_v3, 0.0  ;;  %v1671_v9 = vadd.f32 %v1662_v37, %v1639_v16  ;;  %v1693_v8 = vsel %vm1677_vm12, %v1669_v55, %v1685_v49  ;;  %v2143_v49 = vld [vmem:[%s3024_s8 + $0x8] sm:$0xff]  }
 0x258   :  { %vm1679_vm11 = vcmp.gt.f32.partialorder %v1671_v9, 0.0  ;;  %v1687_v52 = vmul.f32 0.01, %v1671_v9  ;;  %v1694_v30 = vsel %vm1678_vm2, %v1670_v3, %v1686_v18 }
 0x259   :  { %v1698_v46 = vpack.c.bf16 %v1694_v30, %v1692_v34 }
 0x25a   :  { %v1695_v14 = vsel %vm1679_vm11, %v1671_v9, %v1687_v52  ;;  %v1847_v52 = vpop.permute.xlu0 %1846 }
 0x25b   :  { %v1699_v5 = vpack.c.bf16 %v1695_v14, %v1693_v8  ;;  %v1842_v8 = vpop.permute.xlu1 %1841 }
 0x25d   :  { %1757 = vmatprep.subr.bf16.mxu0 %v1699_v5 }
 0x25e   :  { %1758 = vmatpush1.bf16.msra.mxu0 %v1698_v46  ;;  %v1837_v34 = vpop.permute.xlu0 %1836 }
 0x25f   :  { %1759 = vmatprep.subr.bf16.mxu0 %v1697_v12 }
 0x262   :  { %1760 = vmatpush1.bf16.msra.mxu0 %v1696_v38 }
 0x265   :  { %2092 = vmatmul.mubr.msk.bf16.vlgmr.msra.gmra.mxu0 %vm1738_vm10, %v2140_v51 }
 0x266   :  { %1787 = vmatprep.mubr.bf16.mxu0 %v2197_v41 }
 0x26d   :  { %2093 = vmatmul.mubr.msk.bf16.gmra.mxu0 %vm1738_vm10, %v2141_v62 }
 0x26e   :  { %1993 = vmatprep.mubr.bf16.mxu0 %v2197_v41 }
 0x325   :  { %v1779_v61 = vpop.f32.mrf.mxu0 }
 0x326   :  { %v1780_v53 = vadd.f32 %v1779_v61, %v1711_v7 }
 0x327   :  { %v1781_v40 = vpop.f32.mrf.mxu0 }
 0x328   :  { %v1782_v59 = vadd.f32 %v1781_v40, %v1711_v7  ;;  %v1806_v55 = vmul.f32 0.01, %v1780_v53  ;;  %vm1798_vm2 = vcmp.gt.f32.partialorder %v1780_v53, 0.0 }
 0x329   :  { %v1783_v58 = vpop.f32.mrf.mxu0 }
 0x32a   :  { %v1784_v60 = vadd.f32 %v1783_v58, %v1716_v15  ;;  %v1807_v4 = vmul.f32 0.01, %v1782_v59  ;;  %vm1799_vm6 = vcmp.gt.f32.partialorder %v1782_v59, 0.0  ;;  %v1814_v21 = vsel %vm1798_vm2, %v1780_v53, %v1806_v55 }
 0x32b   :  { %v1785_v27 = vpop.f32.mrf.mxu0 }
 0x32c   :  { %v1786_v44 = vadd.f32 %v1785_v27, %v1716_v15  ;;  %v1808_v45 = vmul.f32 0.01, %v1784_v60  ;;  %vm1800_vm8 = vcmp.gt.f32.partialorder %v1784_v60, 0.0  ;;  %v1815_v3 = vsel %vm1799_vm6, %v1782_v59, %v1807_v4 }
 0x32d   :  { %v1789_v22 = vpop.f32.mrf.mxu0 }
 0x32e   :  { %v1790_v26 = vadd.f32 %v1789_v22, %v1721_v19  ;;  %v1809_v24 = vmul.f32 0.01, %v1786_v44  ;;  %vm1801_vm13 = vcmp.gt.f32.partialorder %v1786_v44, 0.0  ;;  %v1816_v29 = vsel %vm1800_vm8, %v1784_v60, %v1808_v45 }
 0x32f   :  { %v1791_v0 = vpop.f32.mrf.mxu0  ;;  %v1822_v18 = vpack.c.bf16 %v1816_v29, %v1814_v21 }
 0x330   :  { %v1792_v48 = vadd.f32 %v1791_v0, %v1721_v19  ;;  %v1810_v13 = vmul.f32 0.01, %v1790_v26  ;;  %vm1802_vm1 = vcmp.gt.f32.partialorder %v1790_v26, 0.0  ;;  %v1817_v63 = vsel %vm1801_vm13, %v1786_v44, %v1809_v24 }
 0x331   :  { %v1793_v28 = vpop.f32.mrf.mxu0  ;;  %v1823_v16 = vpack.c.bf16 %v1817_v63, %v1815_v3 }
 0x332   :  { %v1794_v57 = vadd.f32 %v1793_v28, %v1726_v33  ;;  %v1811_v11 = vmul.f32 0.01, %v1792_v48  ;;  %vm1803_vm14 = vcmp.gt.f32.partialorder %v1792_v48, 0.0  ;;  %v1818_v32 = vsel %vm1802_vm1, %v1790_v26, %v1810_v13 }
 0x333   :  { %v1795_v31 = vpop.f32.mrf.mxu0 }
 0x334   :  { %vm1804_vm4 = vcmp.gt.f32.partialorder %v1794_v57, 0.0  ;;  %v1812_v39 = vmul.f32 0.01, %v1794_v57  ;;  %v1796_v23 = vadd.f32 %v1795_v31, %v1726_v33  ;;  %v1819_v37 = vsel %vm1803_vm14, %v1792_v48, %v1811_v11  ;;  %v1951_v31 = vld [vmem:[%s3026_s10] sm:$0xf]  ;;  %v1956_v11 = vpop.permute.xlu0 %1955  ;;  %s2168_s10 = scalar_lea.vmem %s2017_s7, 256 }
 0x335   :  { %p2169_p0 = scmp.ne.s32.totalorder %s2017_s7, %s2168_s10  ;;  %p2174_p2 = scmp.lt.s32.totalorder %s2168_s10, %s2168_s10 }
 0x336   :  { %vm1805_vm3 = vcmp.gt.f32.partialorder %v1796_v23, 0.0  ;;  %v1813_v17 = vmul.f32 0.01, %v1796_v23  ;;  %v1820_v50 = vsel %vm1804_vm4, %v1794_v57, %v1812_v39 }
 0x337   :  { %v1824_v36 = vpack.c.bf16 %v1820_v50, %v1818_v32  ;;  %p2175_p3 = por %p2174_p2, %p2173_p1 }
 0x338   :  { %v1821_v54 = vsel %vm1805_vm3, %v1796_v23, %v1813_v17 }
 0x339   :  { %v1825_v42 = vpack.c.bf16 %v1821_v54, %v1819_v37  ;;  %p2176_p4 = pnand %p2175_p3, %p2169_p0 }
 0x33b   :  { %1882 = vmatprep.subr.bf16.mxu1 %v1825_v42 }
 0x33c   :  { %1883 = vmatpush1.bf16.msra.mxu1 %v1824_v36 }
 0x33d   :  { %1884 = vmatprep.subr.bf16.mxu1 %v1823_v16 }
 0x340   :  { %1885 = vmatpush1.bf16.msra.mxu1 %v1822_v18 }
 0x343   :  { %2096 = vmatmul.mubr.msk.bf16.vlgmr.msra.gmra.mxu1 %vm1738_vm10, %v2142_v25 }
 0x344   :  { %1912 = vmatprep.mubr.bf16.mxu1 %v2197_v41 }
 0x34b   :  { %2097 = vmatmul.mubr.msk.bf16.gmra.mxu1 %vm1738_vm10, %v2143_v49 }
 0x403   :  { %v1904_v9 = vpop.f32.mrf.mxu1 }
 0x404   :  { %v1905_v61 = vadd.f32 %v1904_v9, %v1837_v34 }
 0x405   :  { %v1906_v43 = vpop.f32.mrf.mxu1 }
 0x406   :  { %v1907_v46 = vadd.f32 %v1906_v43, %v1837_v34  ;;  %v1931_v0 = vmul.f32 0.01, %v1905_v61  ;;  %vm1923_vm4 = vcmp.gt.f32.partialorder %v1905_v61, 0.0 }
 0x407   :  { %v1908_v2 = vpop.f32.mrf.mxu1 }
 0x408   :  { %v1909_v10 = vadd.f32 %v1908_v2, %v1842_v8  ;;  %v1932_v33 = vmul.f32 0.01, %v1907_v46  ;;  %vm1924_vm15 = vcmp.gt.f32.partialorder %v1907_v46, 0.0  ;;  %v1939_v60 = vsel %vm1923_vm4, %v1905_v61, %v1931_v0 }
 0x409   :  { %v1910_v56 = vpop.f32.mrf.mxu1 }
 0x40a   :  { %v1911_v14 = vadd.f32 %v1910_v56, %v1842_v8  ;;  %v1933_v19 = vmul.f32 0.01, %v1909_v10  ;;  %vm1925_vm7 = vcmp.gt.f32.partialorder %v1909_v10, 0.0  ;;  %v1940_v28 = vsel %vm1924_vm15, %v1907_v46, %v1932_v33 }
 0x40b   :  { %v1914_v30 = vpop.f32.mrf.mxu1 }
 0x40c   :  { %v1915_v5 = vadd.f32 %v1914_v30, %v1847_v52  ;;  %v1934_v12 = vmul.f32 0.01, %v1911_v14  ;;  %vm1926_vm12 = vcmp.gt.f32.partialorder %v1911_v14, 0.0  ;;  %v1941_v59 = vsel %vm1925_vm7, %v1909_v10, %v1933_v19 }
 0x40d   :  { %v1916_v6 = vpop.f32.mrf.mxu1  ;;  %v1947_v24 = vpack.c.bf16 %v1941_v59, %v1939_v60 }
 0x40e   :  { %v1917_v35 = vadd.f32 %v1916_v6, %v1847_v52  ;;  %v1935_v40 = vmul.f32 0.01, %v1915_v5  ;;  %vm1927_vm11 = vcmp.gt.f32.partialorder %v1915_v5, 0.0  ;;  %v1942_v44 = vsel %vm1926_vm12, %v1911_v14, %v1934_v12 }
 0x40f   :  { %v1918_v41 = vpop.f32.mrf.mxu1  ;;  %v1948_v57 = vpack.c.bf16 %v1942_v44, %v1940_v28 }
 0x410   :  { %v1919_v20 = vadd.f32 %v1918_v41, %v1852_v47  ;;  %v1936_v38 = vmul.f32 0.01, %v1917_v35  ;;  %vm1928_vm9 = vcmp.gt.f32.partialorder %v1917_v35, 0.0  ;;  %v1943_v48 = vsel %vm1927_vm11, %v1915_v5, %v1935_v40 }
 0x411   :  { %v1920_v1 = vpop.f32.mrf.mxu1 }
 0x412   :  { %vm1929_vm5 = vcmp.gt.f32.partialorder %v1919_v20, 0.0  ;;  %v1937_v51 = vmul.f32 0.01, %v1919_v20  ;;  %v1921_v62 = vadd.f32 %v1920_v1, %v1852_v47  ;;  %v1944_v22 = vsel %vm1928_vm9, %v1917_v35, %v1936_v38 }
 0x414   :  { %vm1930_vm0 = vcmp.gt.f32.partialorder %v1921_v62, 0.0  ;;  %v1938_v58 = vmul.f32 0.01, %v1921_v62  ;;  %v1945_v27 = vsel %vm1929_vm5, %v1919_v20, %v1937_v51 }
 0x415   :  { %v1949_v26 = vpack.c.bf16 %v1945_v27, %v1943_v48 }
 0x416   :  { %v1946_v15 = vsel %vm1930_vm0, %v1921_v62, %v1938_v58 }
 0x417   :  { %v1950_v7 = vpack.c.bf16 %v1946_v15, %v1944_v22 }
 0x419   :  { %1973 = vmatprep.subr.bf16.mxu0 %v1950_v7 }
 0x41a   :  { %1974 = vmatpush1.bf16.msra.mxu0 %v1949_v26 }
 0x41b   :  { %1975 = vmatprep.subr.bf16.mxu0 %v1948_v57 }
 0x41e   :  { %1976 = vmatpush1.bf16.msra.mxu0 %v1947_v24 }
 0x421   :  { %2098 = vmatmul.mubr.msk.bf16.vlgmr.msra.gmra.mxu0 %vm1738_vm10, %v1951_v31 }
 0x4e1   :  { %v1995_v39 = vpop.f32.mrf.mxu0 }
 0x4e2   :  { %v1996_v23 = vadd.f32 %v1995_v39, %v1956_v11 }
 0x4e3   :  { %v1997_v53 = vpop.f32.mrf.mxu0 }
 0x4e4   :  { %vm2002_vm13 = vcmp.gt.f32.partialorder %v1996_v23, 0.0  ;;  %v2004_v13 = vmul.f32 0.01, %v1996_v23  ;;  %v1998_v4 = vadd.f32 %v1997_v53, %v1956_v11 }
 0x4e5   :  { %v1999_v17 = vpop.f32.mrf.mxu0 }
 0x4e6   :  { %vm2003_vm14 = vcmp.gt.f32.partialorder %v1998_v4, 0.0  ;;  %v2005_v45 = vmul.f32 0.01, %v1998_v4  ;;  %v2006_v50 = vsel %vm2002_vm13, %v1996_v23, %v2004_v13 }
 0x4e7   :  { %v2000_v37 = vpop.f32.mrf.mxu0  ;;  %2008 = vst [vmem:[#allocation2] sm:$0xff] %v2006_v50 }
 0x4e8   :  { %v2007_v54 = vsel %vm2003_vm14, %v1998_v4, %v2005_v45 }
 0x4e9   :  { %2009 = vst [vmem:[#allocation2 + $0x8] sm:$0xff] %v2007_v54 }
 0x4ea   :  { %2179 = shalt.err (!%p2176_p4)
}
 0x4eb   :  { %2019 = dma.vmem_to_hbm [thread:$0]  %s2017_s7, 256, %s3028_s12, [#allocation3]  }
 0x4ec   :  { %2188 = dma.done.wait [#allocation3], 256  }
 0x4ed   :  { %2189 = vsyncadd [#allocation3], 4294967040 }
 0x4ee   :  { %2023 = vsyncpa [#allocation3], 1 }

</bundles_post_ra>
